<compile_context>
chip_gen: v6e
topology: v6e:2x2x1
jax: 0.10.0
libtpu: 0.0.40
codegen_flags: <defaults>
</compile_context>

<pallas_src>
import jax
import jax.numpy as jnp
from jax.experimental import pallas as pl
from jax.experimental.pallas import tpu as pltpu


# ----------------------------- kernels --------------------------------------


def _mm_mul_fulln_kernel(x_ref, y_ref, o_ref):
    # x_ref: (tm, K) row tile; y_ref: (K, N) whole y (N == K).
    # Since N == K the epilogue tile of x is exactly the resident row tile, so
    # no second x input and no dynamic slicing is needed.
    v1 = jnp.dot(x_ref[...], y_ref[...], preferred_element_type=jnp.float32)
    o_ref[...] = (v1 * x_ref[...]).astype(o_ref.dtype)


def _mm_mul_tiled_kernel(x_row_ref, y_ref, x_col_ref, o_ref, acc_ref):
    # K-tiled fallback: grid = (M//tm, N//tn, K//tk), K innermost ("arbitrary").
    k = pl.program_id(2)

    @pl.when(k == 0)
    def _init():
        acc_ref[...] = jnp.zeros_like(acc_ref)

    acc_ref[...] += jnp.dot(x_row_ref[...], y_ref[...],
                            preferred_element_type=jnp.float32)

    @pl.when(k == pl.num_programs(2) - 1)
    def _finish():
        # x_col's block index (i, j) is constant over k -> fetched once per
        # output tile; the accumulator never round-trips through HBM.
        o_ref[...] = (acc_ref[...] * x_col_ref[...]).astype(o_ref.dtype)


# ----------------------------- helpers --------------------------------------


def _vmem_capacity_bytes() -> int:
    try:
        info = pltpu.get_tpu_info()
        cap = int(getattr(info, "vmem_capacity_bytes", 0) or 0)
        if cap > 0:
            return cap
    except Exception:
        pass
    return 64 * 1024 * 1024  # conservative: v7x physical VMEM


def _pick_tile(dim: int, target: int, align: int) -> int:
    """Largest tile <= target that divides `dim` and is a multiple of `align`.
    Falls back to the full dim (always a legal block) for awkward sizes."""
    if dim <= target:
        return dim
    t = (target // align) * align
    while t >= align:
        if dim % t == 0:
            return t
        t -= align
    return dim


# ----------------------------- wrapper ---------------------------------------


def mm_mul(x: jax.Array, y: jax.Array, *, tm: int | None = None,
           tn: int | None = None, tk: int | None = None,
           vmem_limit_bytes: int | None = None) -> jax.Array:
    M, K = x.shape
    K2, N = y.shape
    if K != K2:
        raise ValueError("inner dims must match")
    if N != K:
        raise ValueError("v1 * x requires N == K "
                         "(the original sample's shapes are invalid)")

    isz = x.dtype.itemsize
    sublane = {4: 8, 2: 16, 1: 32}.get(isz, 8)

    vmem_limit = vmem_limit_bytes or int(0.75 * _vmem_capacity_bytes())
    budget = int(0.80 * vmem_limit)  # headroom for compiler-internal scratch

    tm_user = tm is not None
    tiles_forced = (tn is not None) or (tk is not None)

    def pick_tm(target: int) -> int:
        return _pick_tile(M, target, sublane)

    # Prefer >= 2 blocks along the parallel M axis so megacore (v7x) has work
    # to split, while keeping tm large enough to be MXU-meaningful.
    tgt0 = min(512, max(sublane, M // 2)) if M >= 2 * sublane else M
    tm_targets = (tgt0, 512, 256, 128, 64, 32, 16, sublane)

    # ---------- fast path: full K (== N) resident per row tile --------------
    # grid = (M//tm,): x streamed from HBM exactly once, y fetched once total
    # (constant block index), epilogue reuses the row tile -> minimal traffic.
    def fulln_bytes(tm_: int) -> int:
        return 2 * isz * (tm_ * K + K * N + tm_ * N)  # double-buffered blocks

    use_full = not tiles_forced
    if use_full:
        if tm_user:
            use_full = fulln_bytes(tm) <= budget
        else:
            tm = None
            for tgt in tm_targets:
                cand = pick_tm(tgt)
                if fulln_bytes(cand) <= budget:
                    tm = cand
                    break
            use_full = tm is not None

    if use_full:
        return pl.pallas_call(
            _mm_mul_fulln_kernel,
            out_shape=jax.ShapeDtypeStruct((M, N), x.dtype),
            grid_spec=pltpu.PrefetchScalarGridSpec(
                num_scalar_prefetch=0,
                grid=(M // tm,),
                in_specs=[
                    pl.BlockSpec((tm, K), lambda i: (i, 0)),  # x row tile
                    pl.BlockSpec((K, N), lambda i: (0, 0)),   # whole y, fetched once
                ],
                out_specs=pl.BlockSpec((tm, N), lambda i: (i, 0)),
            ),
            compiler_params=pltpu.CompilerParams(
                dimension_semantics=("parallel",),
                vmem_limit_bytes=vmem_limit,
            ),
        )(x, y)

    # ---------- tiled fallback: tile N and K, accumulate in VMEM ------------
    if tn is None:
        tn = _pick_tile(N, 512, 128)   # lane-dense output tiles
    if tk is None:
        tk = _pick_tile(K, 512, 128)

    def tiled_bytes(tm_: int) -> int:
        return (2 * isz * (tm_ * tk + tk * tn + tm_ * tn)  # x_row, y, x_col
                + 2 * isz * tm_ * tn                        # output
                + 4 * tm_ * tn)                             # f32 accumulator

    if not tm_user:
        tm = pick_tm(sublane)  # worst-case fallback
        for tgt in tm_targets:
            cand = pick_tm(tgt)
            if tiled_bytes(cand) <= budget:
                tm = cand
                break

    grid = (M // tm, N // tn, K // tk)
    return pl.pallas_call(
        _mm_mul_tiled_kernel,
        out_shape=jax.ShapeDtypeStruct((M, N), x.dtype),
        grid_spec=pltpu.PrefetchScalarGridSpec(
            num_scalar_prefetch=0,
            grid=grid,
            in_specs=[
                pl.BlockSpec((tm, tk), lambda i, j, k: (i, k)),  # x rows (MXU)
                pl.BlockSpec((tk, tn), lambda i, j, k: (k, j)),  # y tile
                pl.BlockSpec((tm, tn), lambda i, j, k: (i, j)),  # x cols (epilogue)
            ],
            out_specs=pl.BlockSpec((tm, tn), lambda i, j, k: (i, j)),
            scratch_shapes=[pltpu.VMEM((tm, tn), jnp.float32)],
        ),
        compiler_params=pltpu.CompilerParams(
            dimension_semantics=("parallel", "parallel", "arbitrary"),
            vmem_limit_bytes=vmem_limit,
        ),
    )(x, y, x)


if __name__ == "__main__":
    # Small but MXU-meaningful shapes; N == K so the elementwise mul is legal
    # (the original (1,224)@(224,2) sample is shape-invalid for torch.mul).
    M, K = 256, 512
    N = K

    key = jax.random.PRNGKey(0)
    kx, ky = jax.random.split(key)
    x = jax.random.normal(kx, (M, K), dtype=jnp.float32)
    y = jax.random.normal(ky, (K, N), dtype=jnp.float32)

    ref = (x @ y) * x

    # Fast path: full-K blocks, x and y each streamed from HBM once.
    out = mm_mul(x, y)
    jax.block_until_ready(out)
    assert out.shape == ref.shape
    err = float(jnp.max(jnp.abs(out - ref)) / (jnp.max(jnp.abs(ref)) + 1e-6))
    assert err < 1e-2, f"fast-path max relative error: {err}"

    # K-tiled fallback path (VMEM accumulator + pl.when init/finalize),
    # forced via explicit tile sizes to exercise it at small shapes.
    out_t = mm_mul(x, y, tm=128, tn=256, tk=256)
    jax.block_until_ready(out_t)
    err_t = float(jnp.max(jnp.abs(out_t - ref)) / (jnp.max(jnp.abs(ref)) + 1e-6))
    assert err_t < 1e-2, f"tiled-path max relative error: {err_t}"

    print("KERNEL_OK")
</pallas_src>

<mosaic_0001>
module attributes {stable_mosaic.version = 11 : i64} {
  func.func @_mm_mul_fulln_kernel(%arg0: i32, %arg1: memref<128x512xf32, #tpu.memory_space<vmem>>, %arg2: memref<512x512xf32, #tpu.memory_space<vmem>>, %arg3: memref<128x512xf32, #tpu.memory_space<vmem>>) attributes {dimension_semantics = [#tpu.dimension_semantics<parallel>], iteration_bounds = array<i64: 2>, scalar_prefetch = 0 : i64, scratch_operands = 0 : i64, tpu.core_type = #tpu.core_type<tc>, window_params = [{transform_indices = @transform_0, window_bounds = array<i64: 128, 512>}, {pipeline_mode = #tpu.pipeline_mode<synchronous>, transform_indices = @transform_1, window_bounds = array<i64: 512, 512>}, {transform_indices = @transform_2, window_bounds = array<i64: 128, 512>}]} {
    %c0 = arith.constant 0 : index
    %c0_0 = arith.constant 0 : index
    %0 = vector.load %arg1[%c0, %c0_0] : memref<128x512xf32, #tpu.memory_space<vmem>>, vector<128x512xf32>
    %c0_1 = arith.constant 0 : index
    %c0_2 = arith.constant 0 : index
    %1 = vector.load %arg2[%c0_1, %c0_2] : memref<512x512xf32, #tpu.memory_space<vmem>>, vector<512x512xf32>
    %cst = arith.constant dense<0.000000e+00> : vector<128x512xf32>
    %2 = tpu.matmul %0, %1, %cst {dimension_numbers = #tpu.dot_dimension_numbers<[1], [0], [0], [1], [0, 0, 1, 1], [], []>} : vector<128x512xf32>, vector<512x512xf32>, vector<128x512xf32> -> vector<128x512xf32>
    %c0_3 = arith.constant 0 : index
    %c0_4 = arith.constant 0 : index
    %3 = vector.load %arg1[%c0_3, %c0_4] : memref<128x512xf32, #tpu.memory_space<vmem>>, vector<128x512xf32>
    %4 = arith.mulf %2, %3 : vector<128x512xf32>
    %c0_5 = arith.constant 0 : index
    %c0_6 = arith.constant 0 : index
    %5 = vector.load %arg3[%c0_5, %c0_6] : memref<128x512xf32, #tpu.memory_space<vmem>>, vector<128x512xf32>
    tpu.vector_store %arg3[%c0_5, %c0_6], %4 {strides = array<i32>} : memref<128x512xf32, #tpu.memory_space<vmem>>, vector<128x512xf32>,
    return
  }
  func.func @transform_0(%arg0: i32) -> (i32, i32) {
    %c0_i32 = arith.constant 0 : i32
    %c0_i32_0 = arith.constant 0 : i32
    return %arg0, %c0_i32 : i32, i32
  }
  func.func @transform_1(%arg0: i32) -> (i32, i32) {
    %c0_i32 = arith.constant 0 : i32
    %c0_i32_0 = arith.constant 0 : i32
    %c0_i32_1 = arith.constant 0 : i32
    return %c0_i32, %c0_i32_0 : i32, i32
  }
  func.func @transform_2(%arg0: i32) -> (i32, i32) {
    %c0_i32 = arith.constant 0 : i32
    %c0_i32_0 = arith.constant 0 : i32
    return %arg0, %c0_i32 : i32, i32
  }
}

</mosaic_0001>

<bundles_post_ra>
// kernel: tpu_custom_call.1
= control target key start
LH: loop header
LB: loop body
LE: loop exit
PB: predicated region body
PF: predicated region fallthrough
CT: control target
= control target key end

     0   :  { %7 = vsyncpa [#allocation3], 0  ;;  %s2256_s0 = inlined_call_operand.hbm [shape: f32[256,512], index: 0, kind: input, shape index: {}]   ;;  %s2257_s1 = inlined_call_operand.hbm [shape: f32[512,512], index: 1, kind: input, shape index: {}]   ;;  %s2258_s2 = inlined_call_operand.hbm [shape: f32[256,512], index: 2, kind: output, shape index: {}]  }
   0x1   :  { %9 = vsyncpa [#allocation3 + $0x1], 0 }
   0x2   :  { %10 = vsyncpa [#allocation6], 0 }
   0x3   :  { %11 = vsyncpa [#allocation4], 0 }
   0x4   :  { %13 = vsyncpa [#allocation4 + $0x1], 0  ;;  %s1616_s9 = smov 0   ;;  %s1618_s10 = smov 0  }
   0x5   :  { %s1620_s11 = smov 0   ;;  %s1622_s12 = smov 0  }
   0x6 LB: > { %s1637_s13 = sadd.s32 4294967295, %s1592_s12   ;;  %s1370_s14 = sadd.s32 4294967294, %s1592_s12   ;;  %s1592_s12 = sphi %s1622_s12, %s2320_s12   ;;  %s1588_s11 = sphi %s1620_s11, %s2319_s11   ;;  %s1584_s10 = sphi %s1618_s10, %s2318_s10   ;;  %s1580_s9 = sphi %s1616_s9, %s2317_s9  }
   0x7   : > { %p39_p0 = scmp.ne.s32.totalorder %s1584_s10, %s1580_s9  ;;  %p2259_p1 = scmp.eq.s32.totalorder %s1637_s13, 0 }
   0x8   : > { %p90_p3 = scmp.eq.s32.totalorder %s1370_s14, 1  ;;  %p1371_p5 = scmp.ge.s32.totalorder %s1592_s12, 1 }
   0x9   : > { %p1646_p4 = por %p2259_p1, %p39_p0  ;;  %p97_p7 = scmp.lt.s32.totalorder %s1592_s12, 3 }
   0xa   : > { %p1651_p6 = por %p90_p3, %p39_p0  ;;  %s1594_s18 = smov [#allocation5]  }
   0xb   : > { %s2283_s15 = scalar_select %p1646_p4, 1, 0 }
   0xc   : > { %s2284_s16 = scalar_select %p1651_p6, 1, 0 }
   0xd   : > { %p1656_p8 = pnand %p1371_p5, %p97_p7  ;;  %s109_s19 = sshll.u32 %s1594_s18, 4  ;;  %s110_s19 = int_to_ptr.vmem [resolvable:$true] %s109_s19 }
   0xe   : > { %s1670_s21 = sadd.s32 1, %s1592_s12   ;;  %s26_s22 = sadd.s32 1, %s1588_s11 }
   0xf   : > { %s2285_s17 = scalar_select %p1656_p8, 1, 0 }
  0x10   : > { %p1400_p9 = pneg %p1656_p8  ;;  %s23_s23 = ssub.s32 %s1592_s12, %s1670_s21 }
  0x11   : > { %s1481_s24 = scalar_lea.vmem %s110_s19, 32768  ;;  %p1489_p5 = scmp.lt.s32.totalorder %s110_s19, %s110_s19 }
  0x12   : > { %p1665_p11 = pnand %p1400_p9, %p2259_p1  ;;  %p1482_p13 = scmp.ne.s32.totalorder %s110_s19, %s1481_s24 }
  0x13   : > { %p1490_p7 = scmp.lt.s32.totalorder %s1481_s24, %s1481_s24 }
  0x14   : > { %p1472_p12 = pneg %p1665_p11 }
  0x15   : > { %p1491_p10 = por %p1490_p7, %p1489_p5 }
  0x16   : > { %p1484_p0 = pnand %p1482_p13, %p1472_p12 }
  0x18   : > { %p1485_p3 = pneg %p1484_p0 }
  0x1a   : > { %p1492_p2 = pnand %p1491_p10, %p1485_p3 }
  0x1c   : > { %1495 = shalt.err (!%p1492_p2)
}
  0x1d   : > { %s1595_s25 = smov 512   ;;  %s1596_s26 = smov 32  }
  0x1e   : > { %1403 = dma.hbm_to_vmem [thread:$0]  (!%p1665_p11), %s2257_s1, 32768, %s110_s19, [#allocation6], %s1595_s25, %s1595_s25, %s1596_s26  }
  0x1f   : > { %p24_p2 = scmp.eq.s32.totalorder %s23_s23, 0  ;;  %p33_p9 = scmp.ne.s32.totalorder %s1588_s11, %s1584_s10 }
  0x20   : > { %p34_p10 = scmp.eq.s32.totalorder %s1592_s12, 0  ;;  %p1413_p12 = scmp.lt.s32.totalorder %s1592_s12, 2 }
  0x21   : > { %s1690_s29 = scalar_select %p24_p2, %s1588_s11, %s26_s22  }
  0x22   : > { %p35_p13 = por %p34_p10, %p33_p9  ;;  %p2287_p0 = scmp.eq.s32.totalorder %s1637_s13, 1 }
  0x23   : > { %s123_s3 = sand.u32 1, %s1588_s11   ;;  %s1389_s4 = sshll.u32 %s1592_s12, 13 }
  0x24   : > { %p1694_p3 = por %p2287_p0, %p33_p9  ;;  %s1374_s5 = sshll.u32 %s123_s3, 9 }
  0x25   : > { %s1703_s8 = scalar_lea.hbm %s2256_s0, %s1389_s4  ;;  %s127_s14 = scalar_lea.vmem [#allocation2], %s1374_s5 }
  0x26   : > { %s2288_s30 = scalar_select %p1694_p3, 1, 0 }
  0x27   : > { %s135_s18 = sshll.u32 %s127_s14, 4  ;;  %p1705_p11 = pnand %p1413_p12, %p35_p13  ;;  %s1709_s18 = int_to_ptr.vmem [resolvable:$true] %s135_s18 }
  0x28   : > { %s1711_s20 = scalar_lea.sflag [#allocation3], %s123_s3  ;;  %s1496_s22 = scalar_lea.hbm %s1703_s8, 8192 }
  0x29   : > { %p1497_p5 = scmp.ne.s32.totalorder %s1703_s8, %s1496_s22  ;;  %p1498_p7 = pneg %p1705_p11 }
  0x2a   : > { %s1501_s27 = scalar_lea.hbm %s2256_s0, 16384  ;;  %p1502_p10 = scmp.lt.s32.totalorder %s1703_s8, %s2256_s0 }
  0x2b   : > { %p1499_p2 = pnand %p1498_p7, %p1497_p5  ;;  %p1503_p12 = scmp.lt.s32.totalorder %s1501_s27, %s1496_s22 }
  0x2d   : > { %p1500_p9 = pneg %p1499_p2  ;;  %p1504_p13 = por %p1503_p12, %p1502_p10 }
  0x2f   : > { %p1505_p0 = pnand %p1504_p13, %p1500_p9 }
  0x31   : > { %1508 = shalt.err (!%p1505_p0)
}
  0x32   : > { %s1509_s3 = scalar_lea.vmem %s1709_s18, 8192  ;;  %s1597_s5 = smov [#allocation2]  }
  0x33   : > { %p1510_p1 = scmp.ne.s32.totalorder %s1709_s18, %s1509_s3  ;;  %s1514_s6 = sshll.u32 %s1597_s5, 4  ;;  %s1515_s6 = int_to_ptr.vmem [resolvable:$false] %s1514_s6 }
  0x34   : > { %s1516_s7 = scalar_lea.vmem %s1515_s6, 16384  ;;  %p1517_p2 = scmp.lt.s32.totalorder %s1709_s18, %s1515_s6 }
  0x35   : > { %p1512_p6 = pnand %p1510_p1, %p1498_p7  ;;  %p1518_p3 = scmp.lt.s32.totalorder %s1516_s7, %s1509_s3 }
  0x37   : > { %p1513_p5 = pneg %p1512_p6  ;;  %p1519_p4 = por %p1518_p3, %p1517_p2 }
  0x39   : > { %p1520_p8 = pnand %p1519_p4, %p1513_p5 }
  0x3b   : > { %1523 = shalt.err (!%p1520_p8)
}
  0x3c   : > { %1407 = dma.hbm_to_vmem [thread:$0]  (!%p1705_p11), %s1703_s8, 8192, %s1709_s18, %s1711_s20, %s1595_s25, %s1595_s25, %s1596_s26  }
  0x3d   : > { %p2290_p1 = scmp.ne.s32.totalorder %s2285_s17, 0 }
  0x3f   : > { %147 = sbr.rel (%p2290_p1) target bundleno = 511 (0x1ff), region = 28 }
  0x44   : > { %s1738_s14 = sand.u32 1, %s1584_s10   ;;  %p2291_p4 = scmp.ne.s32.totalorder %s2283_s15, 0 }
  0x45   : > { %s1379_s22 = sshll.u32 %s1738_s14, 9  ;;  %s150_s23 = scalar_lea.sflag [#allocation3], %s1738_s14 }
  0x46   : > { %s1744_s19 = scalar_lea.vmem [#allocation2], %s1379_s22 }
  0x47   : > { %1567 = dma.done.wait (%p2291_p4), %s150_s23, 8192  }
  0x48   : > { %1569 = vsyncadd (%p2291_p4), %s150_s23, 4294959104  ;;  %p2292_p6 = scmp.eq.s32.totalorder %s1637_s13, 0 }
  0x4a   : > { %1571 = dma.done.wait (%p2292_p6), [#allocation6], 32768   ;;  %p2293_p8 = pmov %p2292_p6 }
  0x4b   : > { %v305_v0 = vld [vmem:[#allocation5 + $0x1e8] sm:$0xff]  ;;  %v304_v2 = vld [vmem:[#allocation5 + $0x1e0] sm:$0xff]  ;;  %s2077_s15 = scalar_lea.vmem [#allocation7], %s1379_s22  ;;  %s1391_s17 = sshll.u32 %s1637_s13, 13 }
  0x4c   : > { %1573 = vsyncadd (%p2293_p8), [#allocation6], 4294934528  ;;  %v433_v1 = vld [vmem:[#allocation5 + $0x5e8] sm:$0xff]  ;;  %500 = vmatprep.subr.mxu0 %v305_v0  ;;  %v432_v3 = vld [vmem:[#allocation5 + $0x5e0] sm:$0xff]  ;;  %s1287_s25 = sshll.u32 %s2077_s15, 4  ;;  %s2208_s18 = scalar_lea.hbm %s2258_s2, %s1391_s17  ;;  %s2210_s25 = int_to_ptr.vmem [resolvable:$true] %s1287_s25 }
  0x4d   : > { %661 = vmatprep.subr.mxu1 %v433_v1  ;;  %v301_v4 = vld [vmem:[#allocation5 + $0x1c8] sm:$0xff]  ;;  %501 = vmatpush1.msra.mxu0 %v304_v2  ;;  %v300_v6 = vld [vmem:[#allocation5 + $0x1c0] sm:$0xff]  ;;  %s1273_s13 = scalar_lea.sflag [#allocation4], %s1738_s14  ;;  %s1524_s20 = scalar_lea.vmem %s2210_s25, 8192 }
  0x4e   : > { %v429_v5 = vld [vmem:[#allocation5 + $0x5c8] sm:$0xff]  ;;  %662 = vmatpush1.msra.mxu1 %v432_v3  ;;  %v428_v7 = vld [vmem:[#allocation5 + $0x5c0] sm:$0xff]  ;;  %502 = vmatprep.subr.mxu0 %v301_v4  ;;  %p1525_p3 = scmp.ne.s32.totalorder %s2210_s25, %s1524_s20  ;;  %p2314_p11 = scmp.ne.s32.totalorder %s2288_s30, 0 }
  0x4f   : > { %v297_v8 = vld [vmem:[#allocation5 + $0x1a8] sm:$0xff]  ;;  %663 = vmatprep.subr.mxu1 %v429_v5  ;;  %v296_v10 = vld [vmem:[#allocation5 + $0x1a0] sm:$0xff]  ;;  %503 = vmatpush1.msra.mxu0 %v300_v6  ;;  %s1598_s24 = smov [#allocation7]  }
  0x50   : > { %v425_v9 = vld [vmem:[#allocation5 + $0x5a8] sm:$0xff]  ;;  %v424_v11 = vld [vmem:[#allocation5 + $0x5a0] sm:$0xff]  ;;  %664 = vmatpush1.msra.mxu1 %v428_v7  ;;  %504 = vmatprep.subr.mxu0 %v297_v8  ;;  %p1526_p7 = pnand %p1525_p3, %p2314_p11  ;;  %s1528_s27 = sshll.u32 %s1598_s24, 4  ;;  %s1529_s27 = int_to_ptr.vmem [resolvable:$false] %s1528_s27 }
  0x51   : > { %v293_v12 = vld [vmem:[#allocation5 + $0x188] sm:$0xff]  ;;  %665 = vmatprep.subr.mxu1 %v425_v9  ;;  %v292_v14 = vld [vmem:[#allocation5 + $0x180] sm:$0xff]  ;;  %505 = vmatpush1.msra.mxu0 %v296_v10  ;;  %s1530_s28 = scalar_lea.vmem %s1529_s27, 16384  ;;  %p1531_p10 = scmp.lt.s32.totalorder %s2210_s25, %s1529_s27 }
  0x52   : > { %v421_v13 = vld [vmem:[#allocation5 + $0x588] sm:$0xff]  ;;  %v420_v15 = vld [vmem:[#allocation5 + $0x580] sm:$0xff]  ;;  %666 = vmatpush1.msra.mxu1 %v424_v11  ;;  %506 = vmatprep.subr.mxu0 %v293_v12  ;;  %p1527_p9 = pneg %p1526_p7  ;;  %p1532_p12 = scmp.lt.s32.totalorder %s1530_s28, %s1524_s20 }
  0x53   : > { %v289_v16 = vld [vmem:[#allocation5 + $0x168] sm:$0xff]  ;;  %667 = vmatprep.subr.mxu1 %v421_v13  ;;  %v288_v18 = vld [vmem:[#allocation5 + $0x160] sm:$0xff]  ;;  %507 = vmatpush1.msra.mxu0 %v292_v14 }
  0x54   : > { %v417_v17 = vld [vmem:[#allocation5 + $0x568] sm:$0xff]  ;;  %v416_v19 = vld [vmem:[#allocation5 + $0x560] sm:$0xff]  ;;  %668 = vmatpush1.msra.mxu1 %v420_v15  ;;  %508 = vmatprep.subr.mxu0 %v289_v16  ;;  %p1533_p13 = por %p1532_p12, %p1531_p10 }
  0x55   : > { %v285_v20 = vld [vmem:[#allocation5 + $0x148] sm:$0xff]  ;;  %669 = vmatprep.subr.mxu1 %v417_v17  ;;  %v284_v22 = vld [vmem:[#allocation5 + $0x140] sm:$0xff]  ;;  %509 = vmatpush1.msra.mxu0 %v288_v18 }
  0x56   : > { %v413_v21 = vld [vmem:[#allocation5 + $0x548] sm:$0xff]  ;;  %v412_v23 = vld [vmem:[#allocation5 + $0x540] sm:$0xff]  ;;  %670 = vmatpush1.msra.mxu1 %v416_v19  ;;  %510 = vmatprep.subr.mxu0 %v285_v20  ;;  %p1534_p0 = pnand %p1533_p13, %p1527_p9 }
  0x57   : > { %v281_v24 = vld [vmem:[#allocation5 + $0x128] sm:$0xff]  ;;  %671 = vmatprep.subr.mxu1 %v413_v21  ;;  %v280_v26 = vld [vmem:[#allocation5 + $0x120] sm:$0xff]  ;;  %511 = vmatpush1.msra.mxu0 %v284_v22 }
  0x58   : > { %v409_v25 = vld [vmem:[#allocation5 + $0x528] sm:$0xff]  ;;  %v408_v27 = vld [vmem:[#allocation5 + $0x520] sm:$0xff]  ;;  %672 = vmatpush1.msra.mxu1 %v412_v23  ;;  %512 = vmatprep.subr.mxu0 %v281_v24 }
  0x59   : > { %v277_v28 = vld [vmem:[#allocation5 + $0x108] sm:$0xff]  ;;  %673 = vmatprep.subr.mxu1 %v409_v25  ;;  %v276_v30 = vld [vmem:[#allocation5 + $0x100] sm:$0xff]  ;;  %513 = vmatpush1.msra.mxu0 %v280_v26 }
  0x5a   : > { %v405_v29 = vld [vmem:[#allocation5 + $0x508] sm:$0xff]  ;;  %v404_v31 = vld [vmem:[#allocation5 + $0x500] sm:$0xff]  ;;  %674 = vmatpush1.msra.mxu1 %v408_v27  ;;  %514 = vmatprep.subr.mxu0 %v277_v28 }
  0x5b   : > { %v273_v32 = vld [vmem:[#allocation5 + $0xe8] sm:$0xff]  ;;  %675 = vmatprep.subr.mxu1 %v405_v29  ;;  %v272_v34 = vld [vmem:[#allocation5 + $0xe0] sm:$0xff]  ;;  %515 = vmatpush1.msra.mxu0 %v276_v30 }
  0x5c   : > { %v401_v33 = vld [vmem:[#allocation5 + $0x4e8] sm:$0xff]  ;;  %v400_v35 = vld [vmem:[#allocation5 + $0x4e0] sm:$0xff]  ;;  %676 = vmatpush1.msra.mxu1 %v404_v31  ;;  %516 = vmatprep.subr.mxu0 %v273_v32 }
  0x5d   : > { %v269_v36 = vld [vmem:[#allocation5 + $0xc8] sm:$0xff]  ;;  %677 = vmatprep.subr.mxu1 %v401_v33  ;;  %v268_v38 = vld [vmem:[#allocation5 + $0xc0] sm:$0xff]  ;;  %517 = vmatpush1.msra.mxu0 %v272_v34 }
  0x5e   : > { %v397_v37 = vld [vmem:[#allocation5 + $0x4c8] sm:$0xff]  ;;  %v396_v39 = vld [vmem:[#allocation5 + $0x4c0] sm:$0xff]  ;;  %678 = vmatpush1.msra.mxu1 %v400_v35  ;;  %518 = vmatprep.subr.mxu0 %v269_v36 }
  0x5f   : > { %v265_v40 = vld [vmem:[#allocation5 + $0xa8] sm:$0xff]  ;;  %679 = vmatprep.subr.mxu1 %v397_v37  ;;  %v264_v42 = vld [vmem:[#allocation5 + $0xa0] sm:$0xff]  ;;  %519 = vmatpush1.msra.mxu0 %v268_v38 }
  0x60   : > { %v393_v41 = vld [vmem:[#allocation5 + $0x4a8] sm:$0xff]  ;;  %v392_v43 = vld [vmem:[#allocation5 + $0x4a0] sm:$0xff]  ;;  %680 = vmatpush1.msra.mxu1 %v396_v39  ;;  %520 = vmatprep.subr.mxu0 %v265_v40 }
  0x61   : > { %v261_v44 = vld [vmem:[#allocation5 + $0x88] sm:$0xff]  ;;  %681 = vmatprep.subr.mxu1 %v393_v41  ;;  %v260_v46 = vld [vmem:[#allocation5 + $0x80] sm:$0xff]  ;;  %521 = vmatpush1.msra.mxu0 %v264_v42 }
  0x62   : > { %v389_v45 = vld [vmem:[#allocation5 + $0x488] sm:$0xff]  ;;  %v388_v47 = vld [vmem:[#allocation5 + $0x480] sm:$0xff]  ;;  %682 = vmatpush1.msra.mxu1 %v392_v43  ;;  %522 = vmatprep.subr.mxu0 %v261_v44 }
  0x63   : > { %v257_v48 = vld [vmem:[#allocation5 + $0x68] sm:$0xff]  ;;  %683 = vmatprep.subr.mxu1 %v389_v45  ;;  %v256_v50 = vld [vmem:[#allocation5 + $0x60] sm:$0xff]  ;;  %523 = vmatpush1.msra.mxu0 %v260_v46 }
  0x64   : > { %v385_v49 = vld [vmem:[#allocation5 + $0x468] sm:$0xff]  ;;  %v384_v51 = vld [vmem:[#allocation5 + $0x460] sm:$0xff]  ;;  %684 = vmatpush1.msra.mxu1 %v388_v47  ;;  %524 = vmatprep.subr.mxu0 %v257_v48 }
  0x65   : > { %v253_v52 = vld [vmem:[#allocation5 + $0x48] sm:$0xff]  ;;  %685 = vmatprep.subr.mxu1 %v385_v49  ;;  %v252_v54 = vld [vmem:[#allocation5 + $0x40] sm:$0xff]  ;;  %525 = vmatpush1.msra.mxu0 %v256_v50 }
  0x66   : > { %v381_v53 = vld [vmem:[#allocation5 + $0x448] sm:$0xff]  ;;  %v380_v55 = vld [vmem:[#allocation5 + $0x440] sm:$0xff]  ;;  %686 = vmatpush1.msra.mxu1 %v384_v51  ;;  %526 = vmatprep.subr.mxu0 %v253_v52 }
  0x67   : > { %v249_v56 = vld [vmem:[#allocation5 + $0x28] sm:$0xff]  ;;  %687 = vmatprep.subr.mxu1 %v381_v53  ;;  %v248_v58 = vld [vmem:[#allocation5 + $0x20] sm:$0xff]  ;;  %527 = vmatpush1.msra.mxu0 %v252_v54 }
  0x68   : > { %v377_v57 = vld [vmem:[#allocation5 + $0x428] sm:$0xff]  ;;  %v376_v59 = vld [vmem:[#allocation5 + $0x420] sm:$0xff]  ;;  %688 = vmatpush1.msra.mxu1 %v380_v55  ;;  %528 = vmatprep.subr.mxu0 %v249_v56 }
  0x69   : > { %v245_v60 = vld [vmem:[#allocation5 + $0x8] sm:$0xff]  ;;  %689 = vmatprep.subr.mxu1 %v377_v57  ;;  %v244_v62 = vld [vmem:[#allocation5] sm:$0xff]  ;;  %529 = vmatpush1.msra.mxu0 %v248_v58 }
  0x6a   : > { %v373_v61 = vld [vmem:[#allocation5 + $0x408] sm:$0xff]  ;;  %v372_v63 = vld [vmem:[#allocation5 + $0x400] sm:$0xff]  ;;  %690 = vmatpush1.msra.mxu1 %v376_v59  ;;  %530 = vmatprep.subr.mxu0 %v245_v60 }
  0x6b   : > { %v369_v0 = vld [vmem:[#allocation5 + $0x3e8] sm:$0xff]  ;;  %691 = vmatprep.subr.mxu1 %v373_v61  ;;  %v368_v2 = vld [vmem:[#allocation5 + $0x3e0] sm:$0xff]  ;;  %531 = vmatpush1.msra.mxu0 %v244_v62 }
  0x6c   : > { %v497_v1 = vld [vmem:[#allocation5 + $0x7e8] sm:$0xff]  ;;  %v496_v3 = vld [vmem:[#allocation5 + $0x7e0] sm:$0xff]  ;;  %692 = vmatpush1.msra.mxu1 %v372_v63  ;;  %532 = vmatprep.subr.mxu0 %v369_v0 }
  0x6d   : > { %v365_v4 = vld [vmem:[#allocation5 + $0x3c8] sm:$0xff]  ;;  %693 = vmatprep.subr.mxu1 %v497_v1  ;;  %v364_v6 = vld [vmem:[#allocation5 + $0x3c0] sm:$0xff]  ;;  %533 = vmatpush2.msra.mxu0 %v368_v2  ;;  %v1758_v1 = vld [vmem:[%s1744_s19 + $0x18] sm:$0xff] }
  0x6e   : > { %v493_v5 = vld [vmem:[#allocation5 + $0x7c8] sm:$0xff]  ;;  %v492_v7 = vld [vmem:[#allocation5 + $0x7c0] sm:$0xff]  ;;  %694 = vmatpush2.msra.mxu1 %v496_v3  ;;  %534 = vmatprep.subr.mxu0 %v365_v4  ;;  %v1764_v3 = vld [vmem:[%s1744_s19 + $0x10] sm:$0xff] }
  0x6f   : > { %v361_v8 = vld [vmem:[#allocation5 + $0x3a8] sm:$0xff]  ;;  %695 = vmatprep.subr.mxu1 %v493_v5  ;;  %v360_v10 = vld [vmem:[#allocation5 + $0x3a0] sm:$0xff]  ;;  %535 = vmatpush2.msra.mxu0 %v364_v6  ;;  %v307_v4 = vld [vmem:[#allocation5 + $0x1f8] sm:$0xff] }
  0x70   : > { %v489_v9 = vld [vmem:[#allocation5 + $0x7a8] sm:$0xff]  ;;  %v488_v11 = vld [vmem:[#allocation5 + $0x7a0] sm:$0xff]  ;;  %696 = vmatpush2.msra.mxu1 %v492_v7  ;;  %536 = vmatprep.subr.mxu0 %v361_v8  ;;  %v435_v5 = vld [vmem:[#allocation5 + $0x5f8] sm:$0xff] }
  0x71   : > { %v357_v12 = vld [vmem:[#allocation5 + $0x388] sm:$0xff]  ;;  %697 = vmatprep.subr.mxu1 %v489_v9  ;;  %v356_v14 = vld [vmem:[#allocation5 + $0x380] sm:$0xff]  ;;  %537 = vmatpush2.msra.mxu0 %v360_v10  ;;  %v306_v6 = vld [vmem:[#allocation5 + $0x1f0] sm:$0xff] }
  0x72   : > { %v485_v13 = vld [vmem:[#allocation5 + $0x788] sm:$0xff]  ;;  %v484_v15 = vld [vmem:[#allocation5 + $0x780] sm:$0xff]  ;;  %698 = vmatpush2.msra.mxu1 %v488_v11  ;;  %538 = vmatprep.subr.mxu0 %v357_v12  ;;  %v434_v7 = vld [vmem:[#allocation5 + $0x5f0] sm:$0xff] }
  0x73   : > { %v353_v16 = vld [vmem:[#allocation5 + $0x368] sm:$0xff]  ;;  %699 = vmatprep.subr.mxu1 %v485_v13  ;;  %v352_v18 = vld [vmem:[#allocation5 + $0x360] sm:$0xff]  ;;  %539 = vmatpush2.msra.mxu0 %v356_v14  ;;  %v303_v8 = vld [vmem:[#allocation5 + $0x1d8] sm:$0xff] }
  0x74   : > { %v481_v17 = vld [vmem:[#allocation5 + $0x768] sm:$0xff]  ;;  %v480_v19 = vld [vmem:[#allocation5 + $0x760] sm:$0xff]  ;;  %700 = vmatpush2.msra.mxu1 %v484_v15  ;;  %540 = vmatprep.subr.mxu0 %v353_v16  ;;  %v431_v9 = vld [vmem:[#allocation5 + $0x5d8] sm:$0xff] }
  0x75   : > { %v349_v20 = vld [vmem:[#allocation5 + $0x348] sm:$0xff]  ;;  %701 = vmatprep.subr.mxu1 %v481_v17  ;;  %v348_v22 = vld [vmem:[#allocation5 + $0x340] sm:$0xff]  ;;  %541 = vmatpush2.msra.mxu0 %v352_v18  ;;  %v1774_v11 = vld [vmem:[%s1744_s19 + $0x38] sm:$0xff] }
  0x76   : > { %v477_v21 = vld [vmem:[#allocation5 + $0x748] sm:$0xff]  ;;  %v476_v23 = vld [vmem:[#allocation5 + $0x740] sm:$0xff]  ;;  %702 = vmatpush2.msra.mxu1 %v480_v19  ;;  %542 = vmatprep.subr.mxu0 %v349_v20  ;;  %v302_v12 = vld [vmem:[#allocation5 + $0x1d0] sm:$0xff] }
  0x77   : > { %v345_v24 = vld [vmem:[#allocation5 + $0x328] sm:$0xff]  ;;  %703 = vmatprep.subr.mxu1 %v477_v21  ;;  %v344_v26 = vld [vmem:[#allocation5 + $0x320] sm:$0xff]  ;;  %543 = vmatpush2.msra.mxu0 %v348_v22  ;;  %v430_v13 = vld [vmem:[#allocation5 + $0x5d0] sm:$0xff] }
  0x78   : > { %v473_v25 = vld [vmem:[#allocation5 + $0x728] sm:$0xff]  ;;  %v472_v27 = vld [vmem:[#allocation5 + $0x720] sm:$0xff]  ;;  %704 = vmatpush2.msra.mxu1 %v476_v23  ;;  %544 = vmatprep.subr.mxu0 %v345_v24  ;;  %v1780_v15 = vld [vmem:[%s1744_s19 + $0x30] sm:$0xff] }
  0x79   : > { %v341_v28 = vld [vmem:[#allocation5 + $0x308] sm:$0xff]  ;;  %705 = vmatprep.subr.mxu1 %v473_v25  ;;  %v340_v30 = vld [vmem:[#allocation5 + $0x300] sm:$0xff]  ;;  %545 = vmatpush2.msra.mxu0 %v344_v26  ;;  %v299_v16 = vld [vmem:[#allocation5 + $0x1b8] sm:$0xff] }
  0x7a   : > { %v469_v29 = vld [vmem:[#allocation5 + $0x708] sm:$0xff]  ;;  %v468_v31 = vld [vmem:[#allocation5 + $0x700] sm:$0xff]  ;;  %706 = vmatpush2.msra.mxu1 %v472_v27  ;;  %546 = vmatprep.subr.mxu0 %v341_v28  ;;  %v427_v17 = vld [vmem:[#allocation5 + $0x5b8] sm:$0xff] }
  0x7b   : > { %v337_v32 = vld [vmem:[#allocation5 + $0x2e8] sm:$0xff]  ;;  %707 = vmatprep.subr.mxu1 %v469_v29  ;;  %v336_v34 = vld [vmem:[#allocation5 + $0x2e0] sm:$0xff]  ;;  %547 = vmatpush2.msra.mxu0 %v340_v30  ;;  %v298_v18 = vld [vmem:[#allocation5 + $0x1b0] sm:$0xff] }
  0x7c   : > { %v465_v33 = vld [vmem:[#allocation5 + $0x6e8] sm:$0xff]  ;;  %v464_v35 = vld [vmem:[#allocation5 + $0x6e0] sm:$0xff]  ;;  %708 = vmatpush2.msra.mxu1 %v468_v31  ;;  %548 = vmatprep.subr.mxu0 %v337_v32  ;;  %v426_v19 = vld [vmem:[#allocation5 + $0x5b0] sm:$0xff] }
  0x7d   : > { %v333_v36 = vld [vmem:[#allocation5 + $0x2c8] sm:$0xff]  ;;  %709 = vmatprep.subr.mxu1 %v465_v33  ;;  %v332_v38 = vld [vmem:[#allocation5 + $0x2c0] sm:$0xff]  ;;  %549 = vmatpush2.msra.mxu0 %v336_v34  ;;  %v295_v20 = vld [vmem:[#allocation5 + $0x198] sm:$0xff] }
  0x7e   : > { %v461_v37 = vld [vmem:[#allocation5 + $0x6c8] sm:$0xff]  ;;  %v460_v39 = vld [vmem:[#allocation5 + $0x6c0] sm:$0xff]  ;;  %710 = vmatpush2.msra.mxu1 %v464_v35  ;;  %550 = vmatprep.subr.mxu0 %v333_v36  ;;  %v423_v21 = vld [vmem:[#allocation5 + $0x598] sm:$0xff] }
  0x7f   : > { %v329_v40 = vld [vmem:[#allocation5 + $0x2a8] sm:$0xff]  ;;  %711 = vmatprep.subr.mxu1 %v461_v37  ;;  %v328_v42 = vld [vmem:[#allocation5 + $0x2a0] sm:$0xff]  ;;  %551 = vmatpush2.msra.mxu0 %v332_v38  ;;  %v1790_v23 = vld [vmem:[%s1744_s19 + $0x58] sm:$0xff] }
  0x80   : > { %v457_v41 = vld [vmem:[#allocation5 + $0x6a8] sm:$0xff]  ;;  %v456_v43 = vld [vmem:[#allocation5 + $0x6a0] sm:$0xff]  ;;  %712 = vmatpush2.msra.mxu1 %v460_v39  ;;  %552 = vmatprep.subr.mxu0 %v329_v40  ;;  %v294_v24 = vld [vmem:[#allocation5 + $0x190] sm:$0xff] }
  0x81   : > { %v325_v44 = vld [vmem:[#allocation5 + $0x288] sm:$0xff]  ;;  %713 = vmatprep.subr.mxu1 %v457_v41  ;;  %v324_v46 = vld [vmem:[#allocation5 + $0x280] sm:$0xff]  ;;  %553 = vmatpush2.msra.mxu0 %v328_v42  ;;  %v422_v25 = vld [vmem:[#allocation5 + $0x590] sm:$0xff] }
  0x82   : > { %v453_v45 = vld [vmem:[#allocation5 + $0x688] sm:$0xff]  ;;  %v452_v47 = vld [vmem:[#allocation5 + $0x680] sm:$0xff]  ;;  %714 = vmatpush2.msra.mxu1 %v456_v43  ;;  %554 = vmatprep.subr.mxu0 %v325_v44  ;;  %v1796_v27 = vld [vmem:[%s1744_s19 + $0x50] sm:$0xff] }
  0x83   : > { %v321_v48 = vld [vmem:[#allocation5 + $0x268] sm:$0xff]  ;;  %715 = vmatprep.subr.mxu1 %v453_v45  ;;  %v320_v50 = vld [vmem:[#allocation5 + $0x260] sm:$0xff]  ;;  %555 = vmatpush2.msra.mxu0 %v324_v46  ;;  %v291_v28 = vld [vmem:[#allocation5 + $0x178] sm:$0xff] }
  0x84   : > { %v449_v49 = vld [vmem:[#allocation5 + $0x668] sm:$0xff]  ;;  %v448_v51 = vld [vmem:[#allocation5 + $0x660] sm:$0xff]  ;;  %716 = vmatpush2.msra.mxu1 %v452_v47  ;;  %556 = vmatprep.subr.mxu0 %v321_v48  ;;  %v419_v29 = vld [vmem:[#allocation5 + $0x578] sm:$0xff] }
  0x85   : > { %v317_v52 = vld [vmem:[#allocation5 + $0x248] sm:$0xff]  ;;  %717 = vmatprep.subr.mxu1 %v449_v49  ;;  %v316_v54 = vld [vmem:[#allocation5 + $0x240] sm:$0xff]  ;;  %557 = vmatpush2.msra.mxu0 %v320_v50  ;;  %v290_v30 = vld [vmem:[#allocation5 + $0x170] sm:$0xff] }
  0x86   : > { %v445_v53 = vld [vmem:[#allocation5 + $0x648] sm:$0xff]  ;;  %v444_v55 = vld [vmem:[#allocation5 + $0x640] sm:$0xff]  ;;  %718 = vmatpush2.msra.mxu1 %v448_v51  ;;  %558 = vmatprep.subr.mxu0 %v317_v52  ;;  %v418_v31 = vld [vmem:[#allocation5 + $0x570] sm:$0xff] }
  0x87   : > { %v313_v56 = vld [vmem:[#allocation5 + $0x228] sm:$0xff]  ;;  %719 = vmatprep.subr.mxu1 %v445_v53  ;;  %v312_v58 = vld [vmem:[#allocation5 + $0x220] sm:$0xff]  ;;  %559 = vmatpush2.msra.mxu0 %v316_v54  ;;  %v287_v32 = vld [vmem:[#allocation5 + $0x158] sm:$0xff] }
  0x88   : > { %v441_v57 = vld [vmem:[#allocation5 + $0x628] sm:$0xff]  ;;  %v440_v59 = vld [vmem:[#allocation5 + $0x620] sm:$0xff]  ;;  %720 = vmatpush2.msra.mxu1 %v444_v55  ;;  %560 = vmatprep.subr.mxu0 %v313_v56  ;;  %v415_v33 = vld [vmem:[#allocation5 + $0x558] sm:$0xff] }
  0x89   : > { %v309_v60 = vld [vmem:[#allocation5 + $0x208] sm:$0xff]  ;;  %721 = vmatprep.subr.mxu1 %v441_v57  ;;  %v308_v62 = vld [vmem:[#allocation5 + $0x200] sm:$0xff]  ;;  %561 = vmatpush2.msra.mxu0 %v312_v58  ;;  %v1806_v35 = vld [vmem:[%s1744_s19 + $0x78] sm:$0xff] }
  0x8a   : > { %v437_v61 = vld [vmem:[#allocation5 + $0x608] sm:$0xff]  ;;  %722 = vmatpush2.msra.mxu1 %v440_v59  ;;  %v436_v0 = vld [vmem:[#allocation5 + $0x600] sm:$0xff]  ;;  %562 = vmatprep.subr.mxu0 %v309_v60  ;;  %v286_v36 = vld [vmem:[#allocation5 + $0x150] sm:$0xff] }
  0x8b   : > { %v1755_v63 = vld [vmem:[%s1744_s19 + $0x8] sm:$0xff]  ;;  %723 = vmatprep.subr.mxu1 %v437_v61  ;;  %v1761_v2 = vld [vmem:[%s1744_s19] sm:$0xff]  ;;  %563 = vmatpush2.msra.mxu0 %v308_v62  ;;  %v414_v37 = vld [vmem:[#allocation5 + $0x550] sm:$0xff] }
  0x8c   : > { %564 = vmatprep.mubr.f32.mxu0 %v1755_v63  ;;  %724 = vmatpush2.msra.mxu1 %v436_v0  ;;  %v1771_v10 = vld [vmem:[%s1744_s19 + $0x28] sm:$0xff]  ;;  %v1777_v14 = vld [vmem:[%s1744_s19 + $0x20] sm:$0xff]  ;;  %v1812_v39 = vld [vmem:[%s1744_s19 + $0x70] sm:$0xff] }
  0x8d   : > { %725 = vmatprep.mubr.f32.mxu1 %v1758_v1  ;;  %565 = vmatmul.mubr.f32.vlgmr.msra.gmra.mxu0 %v1761_v2  ;;  %v1787_v22 = vld [vmem:[%s1744_s19 + $0x48] sm:$0xff]  ;;  %v1793_v26 = vld [vmem:[%s1744_s19 + $0x40] sm:$0xff]  ;;  %v283_v40 = vld [vmem:[#allocation5 + $0x138] sm:$0xff] }
  0x8e   : > { %726 = vmatmul.mubr.f32.vlgmr.msra.gmra.mxu1 %v1764_v3  ;;  %822 = vmatprep.subr.mxu0 %v307_v4  ;;  %v1803_v34 = vld [vmem:[%s1744_s19 + $0x68] sm:$0xff]  ;;  %v1809_v38 = vld [vmem:[%s1744_s19 + $0x60] sm:$0xff]  ;;  %v411_v41 = vld [vmem:[#allocation5 + $0x538] sm:$0xff] }
  0x8f   : > { %983 = vmatprep.subr.mxu1 %v435_v5  ;;  %823 = vmatpush1.msra.mxu0 %v306_v6  ;;  %v282_v42 = vld [vmem:[#allocation5 + $0x130] sm:$0xff]  ;;  %v279_v44 = vld [vmem:[#allocation5 + $0x118] sm:$0xff]  ;;  %v1819_v46 = vld [vmem:[%s1744_s19 + $0x88] sm:$0xff] }
  0x90   : > { %984 = vmatpush1.msra.mxu1 %v434_v7  ;;  %824 = vmatprep.subr.mxu0 %v303_v8  ;;  %v410_v43 = vld [vmem:[#allocation5 + $0x530] sm:$0xff]  ;;  %v407_v45 = vld [vmem:[#allocation5 + $0x518] sm:$0xff]  ;;  %v1825_v50 = vld [vmem:[%s1744_s19 + $0x80] sm:$0xff] }
  0x91   : > { %985 = vmatprep.subr.mxu1 %v431_v9  ;;  %570 = vmatprep.mubr.f32.mxu0 %v1771_v10  ;;  %v1822_v47 = vld [vmem:[%s1744_s19 + $0x98] sm:$0xff]  ;;  %v278_v48 = vld [vmem:[#allocation5 + $0x110] sm:$0xff]  ;;  %v1835_v58 = vld [vmem:[%s1744_s19 + $0xa8] sm:$0xff] }
  0x92   : > { %731 = vmatprep.mubr.f32.mxu1 %v1774_v11  ;;  %825 = vmatpush1.msra.mxu0 %v302_v12  ;;  %v406_v49 = vld [vmem:[#allocation5 + $0x510] sm:$0xff]  ;;  %v275_v52 = vld [vmem:[#allocation5 + $0xf8] sm:$0xff]  ;;  %v1841_v62 = vld [vmem:[%s1744_s19 + $0xa0] sm:$0xff] }
  0x93   : > { %986 = vmatpush1.msra.mxu1 %v430_v13  ;;  %571 = vmatmul.mubr.f32.gmra.mxu0 %v1777_v14  ;;  %v1828_v51 = vld [vmem:[%s1744_s19 + $0x90] sm:$0xff]  ;;  %v403_v53 = vld [vmem:[#allocation5 + $0x4f8] sm:$0xff]  ;;  %v1851_v12 = vld [vmem:[%s1744_s19 + $0xc8] sm:$0xff] }
  0x94   : > { %732 = vmatmul.mubr.f32.gmra.mxu1 %v1780_v15  ;;  %826 = vmatprep.subr.mxu0 %v299_v16  ;;  %v274_v54 = vld [vmem:[#allocation5 + $0xf0] sm:$0xff]  ;;  %v271_v56 = vld [vmem:[#allocation5 + $0xd8] sm:$0xff] }
  0x95   : > { %987 = vmatprep.subr.mxu1 %v427_v17  ;;  %827 = vmatpush1.msra.mxu0 %v298_v18  ;;  %v402_v55 = vld [vmem:[#allocation5 + $0x4f0] sm:$0xff]  ;;  %v399_v57 = vld [vmem:[#allocation5 + $0x4d8] sm:$0xff]  ;;  %v1857_v18 = vld [vmem:[%s1744_s19 + $0xc0] sm:$0xff] }
  0x96   : > { %988 = vmatpush1.msra.mxu1 %v426_v19  ;;  %828 = vmatprep.subr.mxu0 %v295_v20  ;;  %v1838_v59 = vld [vmem:[%s1744_s19 + $0xb8] sm:$0xff]  ;;  %v270_v60 = vld [vmem:[#allocation5 + $0xd0] sm:$0xff] }
  0x97   : > { %989 = vmatprep.subr.mxu1 %v423_v21  ;;  %576 = vmatprep.mubr.f32.mxu0 %v1787_v22  ;;  %v398_v61 = vld [vmem:[#allocation5 + $0x4d0] sm:$0xff]  ;;  %v267_v4 = vld [vmem:[#allocation5 + $0xb8] sm:$0xff] }
  0x98   : > { %737 = vmatprep.mubr.f32.mxu1 %v1790_v23  ;;  %829 = vmatpush1.msra.mxu0 %v294_v24  ;;  %v1844_v0 = vld [vmem:[%s1744_s19 + $0xb0] sm:$0xff]  ;;  %v395_v5 = vld [vmem:[#allocation5 + $0x4b8] sm:$0xff] }
  0x99   : > { %990 = vmatpush1.msra.mxu1 %v422_v25  ;;  %577 = vmatmul.mubr.f32.gmra.mxu0 %v1793_v26  ;;  %v266_v6 = vld [vmem:[#allocation5 + $0xb0] sm:$0xff]  ;;  %v263_v8 = vld [vmem:[#allocation5 + $0x98] sm:$0xff] }
  0x9a   : > { %738 = vmatmul.mubr.f32.gmra.mxu1 %v1796_v27  ;;  %830 = vmatprep.subr.mxu0 %v291_v28  ;;  %v394_v7 = vld [vmem:[#allocation5 + $0x4b0] sm:$0xff]  ;;  %v391_v9 = vld [vmem:[#allocation5 + $0x498] sm:$0xff] }
  0x9b   : > { %991 = vmatprep.subr.mxu1 %v419_v29  ;;  %831 = vmatpush1.msra.mxu0 %v290_v30  ;;  %v1854_v13 = vld [vmem:[%s1744_s19 + $0xd8] sm:$0xff]  ;;  %v262_v16 = vld [vmem:[#allocation5 + $0x90] sm:$0xff]  ;;  %v1867_v30 = vld [vmem:[%s1744_s19 + $0xe8] sm:$0xff] }
  0x9c   : > { %992 = vmatpush1.msra.mxu1 %v418_v31  ;;  %832 = vmatprep.subr.mxu0 %v287_v32  ;;  %v390_v17 = vld [vmem:[#allocation5 + $0x490] sm:$0xff]  ;;  %v259_v20 = vld [vmem:[#allocation5 + $0x78] sm:$0xff] }
  0x9d   : > { %993 = vmatprep.subr.mxu1 %v415_v33  ;;  %582 = vmatprep.mubr.f32.mxu0 %v1803_v34  ;;  %v1860_v19 = vld [vmem:[%s1744_s19 + $0xd0] sm:$0xff]  ;;  %v387_v21 = vld [vmem:[#allocation5 + $0x478] sm:$0xff] }
  0x9e   : > { %743 = vmatprep.mubr.f32.mxu1 %v1806_v35  ;;  %833 = vmatpush1.msra.mxu0 %v286_v36  ;;  %v258_v24 = vld [vmem:[#allocation5 + $0x70] sm:$0xff]  ;;  %v255_v28 = vld [vmem:[#allocation5 + $0x58] sm:$0xff]  ;;  %v1873_v36 = vld [vmem:[%s1744_s19 + $0xe0] sm:$0xff] }
  0x9f   : > { %994 = vmatpush1.msra.mxu1 %v414_v37  ;;  %583 = vmatmul.mubr.f32.gmra.mxu0 %v1809_v38  ;;  %v386_v25 = vld [vmem:[#allocation5 + $0x470] sm:$0xff]  ;;  %v383_v29 = vld [vmem:[#allocation5 + $0x458] sm:$0xff] }
  0xa0   : > { %744 = vmatmul.mubr.f32.gmra.mxu1 %v1812_v39  ;;  %834 = vmatprep.subr.mxu0 %v283_v40  ;;  %v1870_v31 = vld [vmem:[%s1744_s19 + $0xf8] sm:$0xff]  ;;  %v254_v32 = vld [vmem:[#allocation5 + $0x50] sm:$0xff] }
  0xa1   : > { %995 = vmatprep.subr.mxu1 %v411_v41  ;;  %835 = vmatpush1.msra.mxu0 %v282_v42  ;;  %v382_v33 = vld [vmem:[#allocation5 + $0x450] sm:$0xff]  ;;  %v251_v40 = vld [vmem:[#allocation5 + $0x38] sm:$0xff] }
  0xa2   : > { %996 = vmatpush1.msra.mxu1 %v410_v43  ;;  %836 = vmatprep.subr.mxu0 %v279_v44  ;;  %v1876_v37 = vld [vmem:[%s1744_s19 + $0xf0] sm:$0xff]  ;;  %v379_v41 = vld [vmem:[#allocation5 + $0x438] sm:$0xff] }
  0xa3   : > { %997 = vmatprep.subr.mxu1 %v407_v45  ;;  %588 = vmatprep.mubr.f32.mxu0 %v1819_v46  ;;  %v250_v42 = vld [vmem:[#allocation5 + $0x30] sm:$0xff]  ;;  %v247_v44 = vld [vmem:[#allocation5 + $0x18] sm:$0xff] }
  0xa4   : > { %749 = vmatprep.mubr.f32.mxu1 %v1822_v47  ;;  %837 = vmatpush1.msra.mxu0 %v278_v48  ;;  %v378_v43 = vld [vmem:[#allocation5 + $0x430] sm:$0xff]  ;;  %v375_v45 = vld [vmem:[#allocation5 + $0x418] sm:$0xff]  ;;  %v1883_v48 = vld [vmem:[%s1744_s19 + $0x108] sm:$0xff] }
  0xa5   : > { %998 = vmatpush1.msra.mxu1 %v406_v49  ;;  %589 = vmatmul.mubr.f32.gmra.mxu0 %v1825_v50  ;;  %v1886_v49 = vld [vmem:[%s1744_s19 + $0x118] sm:$0xff] }
  0xa6   : > { %750 = vmatmul.mubr.f32.gmra.mxu1 %v1828_v51  ;;  %838 = vmatprep.subr.mxu0 %v275_v52  ;;  %v246_v52 = vld [vmem:[#allocation5 + $0x10] sm:$0xff] }
  0xa7   : > { %999 = vmatprep.subr.mxu1 %v403_v53  ;;  %839 = vmatpush1.msra.mxu0 %v274_v54  ;;  %v374_v53 = vld [vmem:[#allocation5 + $0x410] sm:$0xff]  ;;  %v1889_v54 = vld [vmem:[%s1744_s19 + $0x100] sm:$0xff] }
  0xa8   : > { %1000 = vmatpush1.msra.mxu1 %v402_v55  ;;  %840 = vmatprep.subr.mxu0 %v271_v56  ;;  %v1892_v55 = vld [vmem:[%s1744_s19 + $0x110] sm:$0xff]  ;;  %v371_v56 = vld [vmem:[#allocation5 + $0x3f8] sm:$0xff] }
  0xa9   : > { %1001 = vmatprep.subr.mxu1 %v399_v57  ;;  %594 = vmatprep.mubr.f32.mxu0 %v1835_v58  ;;  %v499_v57 = vld [vmem:[#allocation5 + $0x7f8] sm:$0xff] }
  0xaa   : > { %755 = vmatprep.mubr.f32.mxu1 %v1838_v59  ;;  %841 = vmatpush1.msra.mxu0 %v270_v60  ;;  %v370_v60 = vld [vmem:[#allocation5 + $0x3f0] sm:$0xff] }
  0xab   : > { %1002 = vmatpush1.msra.mxu1 %v398_v61  ;;  %595 = vmatmul.mubr.f32.gmra.mxu0 %v1841_v62  ;;  %v498_v61 = vld [vmem:[#allocation5 + $0x7f0] sm:$0xff] }
  0xac   : > { %756 = vmatmul.mubr.f32.gmra.mxu1 %v1844_v0  ;;  %842 = vmatprep.subr.mxu0 %v267_v4  ;;  %v367_v4 = vld [vmem:[#allocation5 + $0x3d8] sm:$0xff] }
  0xad   : > { %1003 = vmatprep.subr.mxu1 %v395_v5  ;;  %843 = vmatpush1.msra.mxu0 %v266_v6  ;;  %v495_v5 = vld [vmem:[#allocation5 + $0x7d8] sm:$0xff]  ;;  %v1899_v6 = vld [vmem:[%s1744_s19 + $0x128] sm:$0xff] }
  0xae   : > { %1004 = vmatpush1.msra.mxu1 %v394_v7  ;;  %844 = vmatprep.subr.mxu0 %v263_v8  ;;  %v1902_v7 = vld [vmem:[%s1744_s19 + $0x138] sm:$0xff]  ;;  %v366_v8 = vld [vmem:[#allocation5 + $0x3d0] sm:$0xff] }
  0xaf   : > { %1005 = vmatprep.subr.mxu1 %v391_v9  ;;  %600 = vmatprep.mubr.f32.mxu0 %v1851_v12  ;;  %v494_v9 = vld [vmem:[#allocation5 + $0x7d0] sm:$0xff] }
  0xb0   : > { %761 = vmatprep.mubr.f32.mxu1 %v1854_v13  ;;  %845 = vmatpush1.msra.mxu0 %v262_v16  ;;  %v1905_v16 = vld [vmem:[%s1744_s19 + $0x120] sm:$0xff] }
  0xb1   : > { %1006 = vmatpush1.msra.mxu1 %v390_v17  ;;  %601 = vmatmul.mubr.f32.gmra.mxu0 %v1857_v18  ;;  %v1908_v17 = vld [vmem:[%s1744_s19 + $0x130] sm:$0xff] }
  0xb2   : > { %762 = vmatmul.mubr.f32.gmra.mxu1 %v1860_v19  ;;  %846 = vmatprep.subr.mxu0 %v259_v20  ;;  %v363_v20 = vld [vmem:[#allocation5 + $0x3b8] sm:$0xff] }
  0xb3   : > { %1007 = vmatprep.subr.mxu1 %v387_v21  ;;  %847 = vmatpush1.msra.mxu0 %v258_v24  ;;  %v491_v21 = vld [vmem:[#allocation5 + $0x7b8] sm:$0xff]  ;;  %v362_v24 = vld [vmem:[#allocation5 + $0x3b0] sm:$0xff] }
  0xb4   : > { %1008 = vmatpush1.msra.mxu1 %v386_v25  ;;  %848 = vmatprep.subr.mxu0 %v255_v28  ;;  %v490_v25 = vld [vmem:[#allocation5 + $0x7b0] sm:$0xff]  ;;  %v359_v28 = vld [vmem:[#allocation5 + $0x398] sm:$0xff] }
  0xb5   : > { %1009 = vmatprep.subr.mxu1 %v383_v29  ;;  %606 = vmatprep.mubr.f32.mxu0 %v1867_v30  ;;  %v487_v29 = vld [vmem:[#allocation5 + $0x798] sm:$0xff] }
  0xb6   : > { %767 = vmatprep.mubr.f32.mxu1 %v1870_v31  ;;  %849 = vmatpush1.msra.mxu0 %v254_v32  ;;  %v1915_v32 = vld [vmem:[%s1744_s19 + $0x148] sm:$0xff] }
  0xb7   : > { %1010 = vmatpush1.msra.mxu1 %v382_v33  ;;  %607 = vmatmul.mubr.f32.gmra.mxu0 %v1873_v36  ;;  %v1918_v33 = vld [vmem:[%s1744_s19 + $0x158] sm:$0xff] }
  0xb8   : > { %768 = vmatmul.mubr.f32.gmra.mxu1 %v1876_v37  ;;  %850 = vmatprep.subr.mxu0 %v251_v40  ;;  %v358_v40 = vld [vmem:[#allocation5 + $0x390] sm:$0xff] }
  0xb9   : > { %1011 = vmatprep.subr.mxu1 %v379_v41  ;;  %851 = vmatpush1.msra.mxu0 %v250_v42  ;;  %v486_v41 = vld [vmem:[#allocation5 + $0x790] sm:$0xff]  ;;  %v1921_v42 = vld [vmem:[%s1744_s19 + $0x140] sm:$0xff] }
  0xba   : > { %1012 = vmatpush1.msra.mxu1 %v378_v43  ;;  %852 = vmatprep.subr.mxu0 %v247_v44  ;;  %v1924_v43 = vld [vmem:[%s1744_s19 + $0x150] sm:$0xff]  ;;  %v355_v44 = vld [vmem:[#allocation5 + $0x378] sm:$0xff] }
  0xbb   : > { %1013 = vmatprep.subr.mxu1 %v375_v45  ;;  %612 = vmatprep.mubr.f32.mxu0 %v1883_v48  ;;  %v483_v45 = vld [vmem:[#allocation5 + $0x778] sm:$0xff] }
  0xbc   : > { %773 = vmatprep.mubr.f32.mxu1 %v1886_v49  ;;  %853 = vmatpush1.msra.mxu0 %v246_v52  ;;  %v354_v52 = vld [vmem:[#allocation5 + $0x370] sm:$0xff] }
  0xbd   : > { %1014 = vmatpush1.msra.mxu1 %v374_v53  ;;  %613 = vmatmul.mubr.f32.gmra.mxu0 %v1889_v54  ;;  %v482_v53 = vld [vmem:[#allocation5 + $0x770] sm:$0xff] }
  0xbe   : > { %774 = vmatmul.mubr.f32.gmra.mxu1 %v1892_v55  ;;  %854 = vmatprep.subr.mxu0 %v371_v56  ;;  %v351_v56 = vld [vmem:[#allocation5 + $0x358] sm:$0xff] }
  0xbf   : > { %1015 = vmatprep.subr.mxu1 %v499_v57  ;;  %855 = vmatpush2.msra.mxu0 %v370_v60  ;;  %v479_v57 = vld [vmem:[#allocation5 + $0x758] sm:$0xff]  ;;  %v1931_v60 = vld [vmem:[%s1744_s19 + $0x168] sm:$0xff] }
  0xc0   : > { %1016 = vmatpush2.msra.mxu1 %v498_v61  ;;  %856 = vmatprep.subr.mxu0 %v367_v4  ;;  %v1934_v61 = vld [vmem:[%s1744_s19 + $0x178] sm:$0xff]  ;;  %v350_v4 = vld [vmem:[#allocation5 + $0x350] sm:$0xff] }
  0xc1   : > { %1017 = vmatprep.subr.mxu1 %v495_v5  ;;  %618 = vmatprep.mubr.f32.mxu0 %v1899_v6  ;;  %v478_v5 = vld [vmem:[#allocation5 + $0x750] sm:$0xff] }
  0xc2   : > { %779 = vmatprep.mubr.f32.mxu1 %v1902_v7  ;;  %857 = vmatpush2.msra.mxu0 %v366_v8  ;;  %v1937_v8 = vld [vmem:[%s1744_s19 + $0x160] sm:$0xff] }
  0xc3   : > { %1018 = vmatpush2.msra.mxu1 %v494_v9  ;;  %619 = vmatmul.mubr.f32.gmra.mxu0 %v1905_v16  ;;  %v1940_v9 = vld [vmem:[%s1744_s19 + $0x170] sm:$0xff] }
  0xc4   : > { %780 = vmatmul.mubr.f32.gmra.mxu1 %v1908_v17  ;;  %858 = vmatprep.subr.mxu0 %v363_v20  ;;  %v347_v20 = vld [vmem:[#allocation5 + $0x338] sm:$0xff] }
  0xc5   : > { %1019 = vmatprep.subr.mxu1 %v491_v21  ;;  %859 = vmatpush2.msra.mxu0 %v362_v24  ;;  %v475_v21 = vld [vmem:[#allocation5 + $0x738] sm:$0xff]  ;;  %v346_v24 = vld [vmem:[#allocation5 + $0x330] sm:$0xff] }
  0xc6   : > { %1020 = vmatpush2.msra.mxu1 %v490_v25  ;;  %860 = vmatprep.subr.mxu0 %v359_v28  ;;  %v474_v25 = vld [vmem:[#allocation5 + $0x730] sm:$0xff]  ;;  %v343_v28 = vld [vmem:[#allocation5 + $0x318] sm:$0xff] }
  0xc7   : > { %1021 = vmatprep.subr.mxu1 %v487_v29  ;;  %624 = vmatprep.mubr.f32.mxu0 %v1915_v32  ;;  %v471_v29 = vld [vmem:[#allocation5 + $0x718] sm:$0xff] }
  0xc8   : > { %785 = vmatprep.mubr.f32.mxu1 %v1918_v33  ;;  %861 = vmatpush2.msra.mxu0 %v358_v40  ;;  %v1947_v40 = vld [vmem:[%s1744_s19 + $0x188] sm:$0xff] }
  0xc9   : > { %1022 = vmatpush2.msra.mxu1 %v486_v41  ;;  %625 = vmatmul.mubr.f32.gmra.mxu0 %v1921_v42  ;;  %v1950_v41 = vld [vmem:[%s1744_s19 + $0x198] sm:$0xff] }
  0xca   : > { %786 = vmatmul.mubr.f32.gmra.mxu1 %v1924_v43  ;;  %862 = vmatprep.subr.mxu0 %v355_v44  ;;  %v342_v44 = vld [vmem:[#allocation5 + $0x310] sm:$0xff] }
  0xcb   : > { %1023 = vmatprep.subr.mxu1 %v483_v45  ;;  %863 = vmatpush2.msra.mxu0 %v354_v52  ;;  %v470_v45 = vld [vmem:[#allocation5 + $0x710] sm:$0xff]  ;;  %v1953_v52 = vld [vmem:[%s1744_s19 + $0x180] sm:$0xff] }
  0xcc   : > { %1024 = vmatpush2.msra.mxu1 %v482_v53  ;;  %864 = vmatprep.subr.mxu0 %v351_v56  ;;  %2294 = vst [vmem:[#allocation11_spill] sm:$0xff] %v1953_v52  ;;  %v1956_v53 = vld [vmem:[%s1744_s19 + $0x190] sm:$0xff]  ;;  %v339_v56 = vld [vmem:[#allocation5 + $0x2f8] sm:$0xff] }
  0xcd   : > { %1025 = vmatprep.subr.mxu1 %v479_v57  ;;  %630 = vmatprep.mubr.f32.mxu0 %v1931_v60  ;;  %2295 = vst [vmem:[#allocation12_spill] sm:$0xff] %v1956_v53  ;;  %v467_v57 = vld [vmem:[#allocation5 + $0x6f8] sm:$0xff] }
  0xce   : > { %791 = vmatprep.mubr.f32.mxu1 %v1934_v61  ;;  %865 = vmatpush2.msra.mxu0 %v350_v4  ;;  %v338_v4 = vld [vmem:[#allocation5 + $0x2f0] sm:$0xff] }
  0xcf   : > { %1026 = vmatpush2.msra.mxu1 %v478_v5  ;;  %631 = vmatmul.mubr.f32.gmra.mxu0 %v1937_v8  ;;  %v466_v5 = vld [vmem:[#allocation5 + $0x6f0] sm:$0xff] }
  0xd0   : > { %792 = vmatmul.mubr.f32.gmra.mxu1 %v1940_v9  ;;  %866 = vmatprep.subr.mxu0 %v347_v20  ;;  %v335_v20 = vld [vmem:[#allocation5 + $0x2d8] sm:$0xff] }
  0xd1   : > { %1027 = vmatprep.subr.mxu1 %v475_v21  ;;  %867 = vmatpush2.msra.mxu0 %v346_v24  ;;  %v463_v21 = vld [vmem:[#allocation5 + $0x6d8] sm:$0xff]  ;;  %v1963_v24 = vld [vmem:[%s1744_s19 + $0x1a8] sm:$0xff] }
  0xd2   : > { %1028 = vmatpush2.msra.mxu1 %v474_v25  ;;  %868 = vmatprep.subr.mxu0 %v343_v28  ;;  %2296 = vst [vmem:[#allocation13_spill] sm:$0xff] %v1963_v24  ;;  %v1966_v25 = vld [vmem:[%s1744_s19 + $0x1b8] sm:$0xff]  ;;  %v334_v28 = vld [vmem:[#allocation5 + $0x2d0] sm:$0xff] }
  0xd3   : > { %1029 = vmatprep.subr.mxu1 %v471_v29  ;;  %636 = vmatprep.mubr.f32.mxu0 %v1947_v40  ;;  %2297 = vst [vmem:[#allocation14_spill] sm:$0xff] %v1966_v25  ;;  %v462_v29 = vld [vmem:[#allocation5 + $0x6d0] sm:$0xff] }
  0xd4   : > { %797 = vmatprep.mubr.f32.mxu1 %v1950_v41  ;;  %869 = vmatpush2.msra.mxu0 %v342_v44  ;;  %v1969_v44 = vld [vmem:[%s1744_s19 + $0x1a0] sm:$0xff] }
  0xd5   : > { %1030 = vmatpush2.msra.mxu1 %v470_v45  ;;  %637 = vmatmul.mubr.f32.gmra.mxu0 %v1953_v52  ;;  %2298 = vst [vmem:[#allocation15_spill] sm:$0xff] %v1969_v44  ;;  %v1972_v45 = vld [vmem:[%s1744_s19 + $0x1b0] sm:$0xff] }
  0xd6   : > { %798 = vmatmul.mubr.f32.gmra.mxu1 %v1956_v53  ;;  %870 = vmatprep.subr.mxu0 %v339_v56  ;;  %2299 = vst [vmem:[#allocation16_spill] sm:$0xff] %v1972_v45  ;;  %v331_v56 = vld [vmem:[#allocation5 + $0x2b8] sm:$0xff]  ;;  %v1979_v53 = vld [vmem:[%s1744_s19 + $0x1c8] sm:$0xff]  ;;  %v2004_v52 = vld [vmem:[%s1744_s19 + $0x1f0] sm:$0xff] }
  0xd7   : > { %1031 = vmatprep.subr.mxu1 %v467_v57  ;;  %871 = vmatpush2.msra.mxu0 %v338_v4  ;;  %v459_v57 = vld [vmem:[#allocation5 + $0x6b8] sm:$0xff]  ;;  %v330_v4 = vld [vmem:[#allocation5 + $0x2b0] sm:$0xff]  ;;  %2300 = vst [vmem:[#allocation17_spill] sm:$0xff] %v1979_v53 }
  0xd8   : > { %1032 = vmatpush2.msra.mxu1 %v466_v5  ;;  %872 = vmatprep.subr.mxu0 %v335_v20  ;;  %v458_v5 = vld [vmem:[#allocation5 + $0x6b0] sm:$0xff]  ;;  %v327_v20 = vld [vmem:[#allocation5 + $0x298] sm:$0xff] }
  0xd9   : > { %1033 = vmatprep.subr.mxu1 %v463_v21  ;;  %642 = vmatprep.mubr.f32.mxu0 %v1963_v24  ;;  %v455_v21 = vld [vmem:[#allocation5 + $0x698] sm:$0xff] }
  0xda   : > { %803 = vmatprep.mubr.f32.mxu1 %v1966_v25  ;;  %873 = vmatpush2.msra.mxu0 %v334_v28  ;;  %v1982_v24 = vld [vmem:[%s1744_s19 + $0x1d8] sm:$0xff]  ;;  %v326_v28 = vld [vmem:[#allocation5 + $0x290] sm:$0xff]  ;;  %v1985_v25 = vld [vmem:[%s1744_s19 + $0x1c0] sm:$0xff] }
  0xdb   : > { %1034 = vmatpush2.msra.mxu1 %v462_v29  ;;  %643 = vmatmul.mubr.f32.gmra.mxu0 %v1969_v44  ;;  %2301 = vst [vmem:[#allocation18_spill] sm:$0xff] %v1982_v24  ;;  %v454_v29 = vld [vmem:[#allocation5 + $0x690] sm:$0xff]  ;;  %2302 = vst [vmem:[#allocation19_spill] sm:$0xff] %v1985_v25 }
  0xdc   : > { %804 = vmatmul.mubr.f32.gmra.mxu1 %v1972_v45  ;;  %874 = vmatprep.subr.mxu0 %v331_v56  ;;  %v1988_v44 = vld [vmem:[%s1744_s19 + $0x1d0] sm:$0xff]  ;;  %v323_v56 = vld [vmem:[#allocation5 + $0x278] sm:$0xff]  ;;  %v1995_v45 = vld [vmem:[%s1744_s19 + $0x1e8] sm:$0xff] }
  0xdd   : > { %1035 = vmatprep.subr.mxu1 %v459_v57  ;;  %875 = vmatpush2.msra.mxu0 %v330_v4  ;;  %2303 = vst [vmem:[#allocation20_spill] sm:$0xff] %v1988_v44  ;;  %v451_v57 = vld [vmem:[#allocation5 + $0x678] sm:$0xff]  ;;  %v322_v4 = vld [vmem:[#allocation5 + $0x270] sm:$0xff] }
  0xde   : > { %1036 = vmatpush2.msra.mxu1 %v458_v5  ;;  %876 = vmatprep.subr.mxu0 %v327_v20  ;;  %v450_v5 = vld [vmem:[#allocation5 + $0x670] sm:$0xff]  ;;  %v319_v20 = vld [vmem:[#allocation5 + $0x258] sm:$0xff] }
  0xdf   : > { %1037 = vmatprep.subr.mxu1 %v455_v21  ;;  %648 = vmatprep.mubr.f32.mxu0 %v1979_v53  ;;  %v447_v21 = vld [vmem:[#allocation5 + $0x658] sm:$0xff] }
  0xe0   : > { %809 = vmatprep.mubr.f32.mxu1 %v1982_v24  ;;  %877 = vmatpush2.msra.mxu0 %v326_v28  ;;  %v1998_v53 = vld [vmem:[%s1744_s19 + $0x1f8] sm:$0xff]  ;;  %v318_v28 = vld [vmem:[#allocation5 + $0x250] sm:$0xff]  ;;  %v2001_v24 = vld [vmem:[%s1744_s19 + $0x1e0] sm:$0xff] }
  0xe1   : > { %1038 = vmatpush2.msra.mxu1 %v454_v29  ;;  %649 = vmatmul.mubr.f32.gmra.mxu0 %v1985_v25  ;;  %v446_v29 = vld [vmem:[#allocation5 + $0x650] sm:$0xff] }
  0xe2   : > { %810 = vmatmul.mubr.f32.gmra.mxu1 %v1988_v44  ;;  %878 = vmatprep.subr.mxu0 %v323_v56  ;;  %v315_v56 = vld [vmem:[#allocation5 + $0x238] sm:$0xff]  ;;  %v314_v44 = vld [vmem:[#allocation5 + $0x230] sm:$0xff] }
  0xe3   : > { %1039 = vmatprep.subr.mxu1 %v451_v57  ;;  %879 = vmatpush2.msra.mxu0 %v322_v4  ;;  %v443_v57 = vld [vmem:[#allocation5 + $0x638] sm:$0xff]  ;;  %v442_v25 = vld [vmem:[#allocation5 + $0x630] sm:$0xff] }
  0xe4   : > { %1040 = vmatpush2.msra.mxu1 %v450_v5  ;;  %880 = vmatprep.subr.mxu0 %v319_v20  ;;  %v311_v4 = vld [vmem:[#allocation5 + $0x218] sm:$0xff]  ;;  %v310_v20 = vld [vmem:[#allocation5 + $0x210] sm:$0xff] }
  0xe5   : > { %1041 = vmatprep.subr.mxu1 %v447_v21  ;;  %654 = vmatprep.mubr.f32.mxu0 %v1995_v45  ;;  %v439_v5 = vld [vmem:[#allocation5 + $0x618] sm:$0xff]  ;;  %v438_v21 = vld [vmem:[#allocation5 + $0x610] sm:$0xff] }
  0xe6   : > { %815 = vmatprep.mubr.f32.mxu1 %v1998_v53  ;;  %881 = vmatpush2.msra.mxu0 %v318_v28 }
  0xe7   : > { %1042 = vmatpush2.msra.mxu1 %v446_v29  ;;  %655 = vmatmul.mubr.f32.gmra.mxu0 %v2001_v24 }
  0xe8   : > { %816 = vmatmul.mubr.f32.gmra.mxu1 %v2004_v52  ;;  %882 = vmatprep.subr.mxu0 %v315_v56 }
  0xe9   : > { %1043 = vmatprep.subr.mxu1 %v443_v57  ;;  %883 = vmatpush2.msra.mxu0 %v314_v44 }
  0xea   : > { %1044 = vmatpush2.msra.mxu1 %v442_v25  ;;  %884 = vmatprep.subr.mxu0 %v311_v4 }
  0xeb   : > { %1045 = vmatprep.subr.mxu1 %v439_v5  ;;  %885 = vmatpush2.msra.mxu0 %v310_v20 }
  0xec   : > { %886 = vmatprep.mubr.f32.mxu0 %v1755_v63  ;;  %1046 = vmatpush2.msra.mxu1 %v438_v21 }
  0xed   : > { %1047 = vmatprep.mubr.f32.mxu1 %v1758_v1  ;;  %887 = vmatmul.mubr.f32.vlgmr.msra.gmra.mxu0 %v1761_v2  ;;  %v2304_v1 = vld [vmem:[#allocation11_spill] sm:$0xff] }
  0xee   : > { %1048 = vmatmul.mubr.f32.vlgmr.msra.gmra.mxu1 %v1764_v3  ;;  %892 = vmatprep.mubr.f32.mxu0 %v1771_v10  ;;  %v2305_v3 = vld [vmem:[#allocation12_spill] sm:$0xff] }
  0xef   : > { %1053 = vmatprep.mubr.f32.mxu1 %v1774_v11  ;;  %v2306_v11 = vld [vmem:[#allocation13_spill] sm:$0xff] }
  0xf1   : > { %893 = vmatmul.mubr.f32.gmra.mxu0 %v1777_v14 }
  0xf2   : > { %1054 = vmatmul.mubr.f32.gmra.mxu1 %v1780_v15  ;;  %898 = vmatprep.mubr.f32.mxu0 %v1787_v22  ;;  %v2307_v15 = vld [vmem:[#allocation14_spill] sm:$0xff] }
  0xf3   : > { %1059 = vmatprep.mubr.f32.mxu1 %v1790_v23  ;;  %v2308_v23 = vld [vmem:[#allocation15_spill] sm:$0xff] }
  0xf5   : > { %899 = vmatmul.mubr.f32.gmra.mxu0 %v1793_v26 }
  0xf6   : > { %1060 = vmatmul.mubr.f32.gmra.mxu1 %v1796_v27  ;;  %904 = vmatprep.mubr.f32.mxu0 %v1803_v34  ;;  %v2309_v27 = vld [vmem:[#allocation16_spill] sm:$0xff] }
  0xf7   : > { %1065 = vmatprep.mubr.f32.mxu1 %v1806_v35  ;;  %v2310_v35 = vld [vmem:[#allocation17_spill] sm:$0xff] }
  0xf9   : > { %905 = vmatmul.mubr.f32.gmra.mxu0 %v1809_v38 }
  0xfa   : > { %1066 = vmatmul.mubr.f32.gmra.mxu1 %v1812_v39  ;;  %910 = vmatprep.mubr.f32.mxu0 %v1819_v46  ;;  %v2311_v39 = vld [vmem:[#allocation18_spill] sm:$0xff] }
  0xfb   : > { %1071 = vmatprep.mubr.f32.mxu1 %v1822_v47  ;;  %v2312_v47 = vld [vmem:[#allocation19_spill] sm:$0xff] }
  0xfd   : > { %911 = vmatmul.mubr.f32.gmra.mxu0 %v1825_v50 }
  0xfe   : > { %1072 = vmatmul.mubr.f32.gmra.mxu1 %v1828_v51  ;;  %916 = vmatprep.mubr.f32.mxu0 %v1835_v58  ;;  %v2313_v51 = vld [vmem:[#allocation20_spill] sm:$0xff] }
  0xff   : > { %1077 = vmatprep.mubr.f32.mxu1 %v1838_v59 }
 0x101   : > { %917 = vmatmul.mubr.f32.gmra.mxu0 %v1841_v62 }
 0x102   : > { %1078 = vmatmul.mubr.f32.gmra.mxu1 %v1844_v0  ;;  %922 = vmatprep.mubr.f32.mxu0 %v1851_v12 }
 0x103   : > { %1083 = vmatprep.mubr.f32.mxu1 %v1854_v13 }
 0x105   : > { %923 = vmatmul.mubr.f32.gmra.mxu0 %v1857_v18 }
 0x106   : > { %1084 = vmatmul.mubr.f32.gmra.mxu1 %v1860_v19  ;;  %928 = vmatprep.mubr.f32.mxu0 %v1867_v30 }
 0x107   : > { %1089 = vmatprep.mubr.f32.mxu1 %v1870_v31 }
 0x109   : > { %929 = vmatmul.mubr.f32.gmra.mxu0 %v1873_v36 }
 0x10a   : > { %1090 = vmatmul.mubr.f32.gmra.mxu1 %v1876_v37  ;;  %934 = vmatprep.mubr.f32.mxu0 %v1883_v48 }
 0x10b   : > { %1095 = vmatprep.mubr.f32.mxu1 %v1886_v49 }
 0x10d   : > { %935 = vmatmul.mubr.f32.gmra.mxu0 %v1889_v54 }
 0x10e   : > { %1096 = vmatmul.mubr.f32.gmra.mxu1 %v1892_v55  ;;  %940 = vmatprep.mubr.f32.mxu0 %v1899_v6 }
 0x10f   : > { %1101 = vmatprep.mubr.f32.mxu1 %v1902_v7 }
 0x111   : > { %941 = vmatmul.mubr.f32.gmra.mxu0 %v1905_v16 }
 0x112   : > { %1102 = vmatmul.mubr.f32.gmra.mxu1 %v1908_v17  ;;  %946 = vmatprep.mubr.f32.mxu0 %v1915_v32 }
 0x113   : > { %1107 = vmatprep.mubr.f32.mxu1 %v1918_v33 }
 0x115   : > { %947 = vmatmul.mubr.f32.gmra.mxu0 %v1921_v42 }
 0x116   : > { %1108 = vmatmul.mubr.f32.gmra.mxu1 %v1924_v43  ;;  %952 = vmatprep.mubr.f32.mxu0 %v1931_v60 }
 0x117   : > { %1113 = vmatprep.mubr.f32.mxu1 %v1934_v61 }
 0x119   : > { %953 = vmatmul.mubr.f32.gmra.mxu0 %v1937_v8 }
 0x11a   : > { %1114 = vmatmul.mubr.f32.gmra.mxu1 %v1940_v9  ;;  %958 = vmatprep.mubr.f32.mxu0 %v1947_v40 }
 0x11b   : > { %1119 = vmatprep.mubr.f32.mxu1 %v1950_v41 }
 0x11d   : > { %959 = vmatmul.mubr.f32.gmra.mxu0 %v2304_v1 }
 0x11e   : > { %1120 = vmatmul.mubr.f32.gmra.mxu1 %v2305_v3  ;;  %964 = vmatprep.mubr.f32.mxu0 %v2306_v11 }
 0x11f   : > { %1125 = vmatprep.mubr.f32.mxu1 %v2307_v15 }
 0x121   : > { %965 = vmatmul.mubr.f32.gmra.mxu0 %v2308_v23 }
 0x122   : > { %1126 = vmatmul.mubr.f32.gmra.mxu1 %v2309_v27  ;;  %970 = vmatprep.mubr.f32.mxu0 %v2310_v35 }
 0x123   : > { %1131 = vmatprep.mubr.f32.mxu1 %v2311_v39 }
 0x125   : > { %971 = vmatmul.mubr.f32.gmra.mxu0 %v2312_v47 }
 0x126   : > { %1132 = vmatmul.mubr.f32.gmra.mxu1 %v2313_v51  ;;  %976 = vmatprep.mubr.f32.mxu0 %v1995_v45 }
 0x127   : > { %1137 = vmatprep.mubr.f32.mxu1 %v1998_v53 }
 0x129   : > { %977 = vmatmul.mubr.f32.gmra.mxu0 %v2001_v24 }
 0x12a   : > { %1138 = vmatmul.mubr.f32.gmra.mxu1 %v2004_v52 }
 0x14d   : > { %v566_v59 = vpop.f32.mrf.mxu0 }
 0x14e   : > { %v727_v0 = vpop.f32.mrf.mxu1 }
 0x14f   : > { %v728_v13 = vadd.f32 %v727_v0, %v566_v59  ;;  %v568_v19 = vpop.f32.mrf.mxu0 }
 0x150   : > { %v729_v31 = vpop.f32.mrf.mxu1 }
 0x151   : > { %v1144_v37 = vmul.f32 %v728_v13, %v1761_v2  ;;  %v730_v49 = vadd.f32 %v729_v31, %v568_v19 }
 0x153   : > { %1208 = vst [vmem:[%s2077_s15] sm:$0xff] %v1144_v37  ;;  %v1145_v25 = vmul.f32 %v730_v49, %v1755_v63  ;;  %v572_v44 = vpop.f32.mrf.mxu0 }
 0x154   : > { %v733_v28 = vpop.f32.mrf.mxu1 }
 0x155   : > { %1209 = vst [vmem:[%s2077_s15 + $0x8] sm:$0xff] %v1145_v25  ;;  %v734_v29 = vadd.f32 %v733_v28, %v572_v44  ;;  %v574_v56 = vpop.f32.mrf.mxu0 }
 0x156   : > { %v735_v57 = vpop.f32.mrf.mxu1 }
 0x157   : > { %v1148_v2 = vmul.f32 %v734_v29, %v1777_v14  ;;  %v736_v4 = vadd.f32 %v735_v57, %v574_v56 }
 0x159   : > { %1212 = vst [vmem:[%s2077_s15 + $0x20] sm:$0xff] %v1148_v2  ;;  %v1149_v5 = vmul.f32 %v736_v4, %v1771_v10  ;;  %v578_v20 = vpop.f32.mrf.mxu0 }
 0x15a   : > { %v739_v21 = vpop.f32.mrf.mxu1 }
 0x15b   : > { %1213 = vst [vmem:[%s2077_s15 + $0x28] sm:$0xff] %v1149_v5  ;;  %v740_v59 = vadd.f32 %v739_v21, %v578_v20  ;;  %v580_v63 = vpop.f32.mrf.mxu0 }
 0x15c   : > { %v741_v0 = vpop.f32.mrf.mxu1 }
 0x15d   : > { %v1152_v13 = vmul.f32 %v740_v59, %v1793_v26  ;;  %v742_v19 = vadd.f32 %v741_v0, %v580_v63 }
 0x15f   : > { %1216 = vst [vmem:[%s2077_s15 + $0x40] sm:$0xff] %v1152_v13  ;;  %v1153_v31 = vmul.f32 %v742_v19, %v1787_v22  ;;  %v584_v14 = vpop.f32.mrf.mxu0 }
 0x160   : > { %v745_v37 = vpop.f32.mrf.mxu1 }
 0x161   : > { %1217 = vst [vmem:[%s2077_s15 + $0x48] sm:$0xff] %v1153_v31  ;;  %v746_v49 = vadd.f32 %v745_v37, %v584_v14  ;;  %v586_v10 = vpop.f32.mrf.mxu0 }
 0x162   : > { %v747_v25 = vpop.f32.mrf.mxu1 }
 0x163   : > { %v1156_v44 = vmul.f32 %v746_v49, %v1809_v38  ;;  %v748_v28 = vadd.f32 %v747_v25, %v586_v10 }
 0x165   : > { %1220 = vst [vmem:[%s2077_s15 + $0x60] sm:$0xff] %v1156_v44  ;;  %v1157_v29 = vmul.f32 %v748_v28, %v1803_v34  ;;  %v590_v26 = vpop.f32.mrf.mxu0 }
 0x166   : > { %v751_v56 = vpop.f32.mrf.mxu1 }
 0x167   : > { %1221 = vst [vmem:[%s2077_s15 + $0x68] sm:$0xff] %v1157_v29  ;;  %v752_v57 = vadd.f32 %v751_v56, %v590_v26  ;;  %v592_v22 = vpop.f32.mrf.mxu0 }
 0x168   : > { %v753_v2 = vpop.f32.mrf.mxu1 }
 0x169   : > { %v1160_v4 = vmul.f32 %v752_v57, %v1825_v50  ;;  %v754_v5 = vadd.f32 %v753_v2, %v592_v22 }
 0x16b   : > { %1224 = vst [vmem:[%s2077_s15 + $0x80] sm:$0xff] %v1160_v4  ;;  %v1161_v20 = vmul.f32 %v754_v5, %v1819_v46  ;;  %v596_v38 = vpop.f32.mrf.mxu0 }
 0x16c   : > { %v757_v21 = vpop.f32.mrf.mxu1 }
 0x16d   : > { %1225 = vst [vmem:[%s2077_s15 + $0x88] sm:$0xff] %v1161_v20  ;;  %v758_v59 = vadd.f32 %v757_v21, %v596_v38  ;;  %v598_v34 = vpop.f32.mrf.mxu0 }
 0x16e   : > { %v759_v63 = vpop.f32.mrf.mxu1 }
 0x16f   : > { %v1164_v0 = vmul.f32 %v758_v59, %v1841_v62  ;;  %v760_v13 = vadd.f32 %v759_v63, %v598_v34 }
 0x171   : > { %1228 = vst [vmem:[%s2077_s15 + $0xa0] sm:$0xff] %v1164_v0  ;;  %v1165_v19 = vmul.f32 %v760_v13, %v1835_v58  ;;  %v602_v50 = vpop.f32.mrf.mxu0 }
 0x172   : > { %v763_v31 = vpop.f32.mrf.mxu1 }
 0x173   : > { %1229 = vst [vmem:[%s2077_s15 + $0xa8] sm:$0xff] %v1165_v19  ;;  %v764_v14 = vadd.f32 %v763_v31, %v602_v50  ;;  %v604_v46 = vpop.f32.mrf.mxu0 }
 0x174   : > { %v765_v37 = vpop.f32.mrf.mxu1 }
 0x175   : > { %v1168_v49 = vmul.f32 %v764_v14, %v1857_v18  ;;  %v766_v10 = vadd.f32 %v765_v37, %v604_v46 }
 0x177   : > { %1232 = vst [vmem:[%s2077_s15 + $0xc0] sm:$0xff] %v1168_v49  ;;  %v1169_v25 = vmul.f32 %v766_v10, %v1851_v12  ;;  %v608_v62 = vpop.f32.mrf.mxu0 }
 0x178   : > { %v769_v44 = vpop.f32.mrf.mxu1 }
 0x179   : > { %1233 = vst [vmem:[%s2077_s15 + $0xc8] sm:$0xff] %v1169_v25  ;;  %v770_v28 = vadd.f32 %v769_v44, %v608_v62  ;;  %v610_v58 = vpop.f32.mrf.mxu0 }
 0x17a   : > { %v771_v29 = vpop.f32.mrf.mxu1 }
 0x17b   : > { %v1172_v26 = vmul.f32 %v770_v28, %v1873_v36  ;;  %v772_v56 = vadd.f32 %v771_v29, %v610_v58 }
 0x17d   : > { %1236 = vst [vmem:[%s2077_s15 + $0xe0] sm:$0xff] %v1172_v26  ;;  %v1173_v57 = vmul.f32 %v772_v56, %v1867_v30  ;;  %v614_v18 = vpop.f32.mrf.mxu0 }
 0x17e   : > { %v775_v22 = vpop.f32.mrf.mxu1 }
 0x17f   : > { %1237 = vst [vmem:[%s2077_s15 + $0xe8] sm:$0xff] %v1173_v57  ;;  %v776_v2 = vadd.f32 %v775_v22, %v614_v18  ;;  %v616_v12 = vpop.f32.mrf.mxu0 }
 0x180   : > { %v777_v4 = vpop.f32.mrf.mxu1 }
 0x181   : > { %v1176_v5 = vmul.f32 %v776_v2, %v1889_v54  ;;  %v778_v20 = vadd.f32 %v777_v4, %v616_v12 }
 0x183   : > { %1240 = vst [vmem:[%s2077_s15 + $0x100] sm:$0xff] %v1176_v5  ;;  %v1177_v38 = vmul.f32 %v778_v20, %v1883_v48  ;;  %v620_v36 = vpop.f32.mrf.mxu0 }
 0x184   : > { %v781_v21 = vpop.f32.mrf.mxu1 }
 0x185   : > { %1241 = vst [vmem:[%s2077_s15 + $0x108] sm:$0xff] %v1177_v38  ;;  %v782_v59 = vadd.f32 %v781_v21, %v620_v36  ;;  %v622_v30 = vpop.f32.mrf.mxu0 }
 0x186   : > { %v783_v34 = vpop.f32.mrf.mxu1 }
 0x187   : > { %v1180_v63 = vmul.f32 %v782_v59, %v1905_v16  ;;  %v784_v0 = vadd.f32 %v783_v34, %v622_v30 }
 0x189   : > { %1244 = vst [vmem:[%s2077_s15 + $0x120] sm:$0xff] %v1180_v63  ;;  %v1181_v13 = vmul.f32 %v784_v0, %v1899_v6  ;;  %v626_v54 = vpop.f32.mrf.mxu0 }
 0x18a   : > { %v787_v19 = vpop.f32.mrf.mxu1 }
 0x18b   : > { %1245 = vst [vmem:[%s2077_s15 + $0x128] sm:$0xff] %v1181_v13  ;;  %v788_v50 = vadd.f32 %v787_v19, %v626_v54  ;;  %v628_v48 = vpop.f32.mrf.mxu0 }
 0x18c   : > { %v789_v31 = vpop.f32.mrf.mxu1 }
 0x18d   : > { %v1184_v14 = vmul.f32 %v788_v50, %v1921_v42  ;;  %v790_v46 = vadd.f32 %v789_v31, %v628_v48 }
 0x18f   : > { %1248 = vst [vmem:[%s2077_s15 + $0x140] sm:$0xff] %v1184_v14  ;;  %v1185_v37 = vmul.f32 %v790_v46, %v1915_v32  ;;  %v632_v16 = vpop.f32.mrf.mxu0  ;;  %v1453_v46 = vld [vmem:[%s1744_s19 + $0x10] sm:$0xff] }
 0x190   : > { %v793_v49 = vpop.f32.mrf.mxu1 }
 0x191   : > { %1249 = vst [vmem:[%s2077_s15 + $0x148] sm:$0xff] %v1185_v37  ;;  %v794_v10 = vadd.f32 %v793_v49, %v632_v16  ;;  %v634_v6 = vpop.f32.mrf.mxu0 }
 0x192   : > { %v795_v25 = vpop.f32.mrf.mxu1 }
 0x193   : > { %v1188_v62 = vmul.f32 %v794_v10, %v1937_v8  ;;  %v796_v44 = vadd.f32 %v795_v25, %v634_v6  ;;  %v1454_v10 = vld [vmem:[%s1744_s19 + $0x18] sm:$0xff] }
 0x195   : > { %1252 = vst [vmem:[%s2077_s15 + $0x160] sm:$0xff] %v1188_v62  ;;  %v1189_v28 = vmul.f32 %v796_v44, %v1931_v60  ;;  %v638_v42 = vpop.f32.mrf.mxu0  ;;  %v1455_v44 = vld [vmem:[%s1744_s19 + $0x30] sm:$0xff] }
 0x196   : > { %v799_v58 = vpop.f32.mrf.mxu1 }
 0x197   : > { %1253 = vst [vmem:[%s2077_s15 + $0x168] sm:$0xff] %v1189_v28  ;;  %v800_v29 = vadd.f32 %v799_v58, %v638_v42  ;;  %v640_v32 = vpop.f32.mrf.mxu0 }
 0x198   : > { %v801_v26 = vpop.f32.mrf.mxu1 }
 0x199   : > { %v1192_v56 = vmul.f32 %v800_v29, %v2304_v1  ;;  %v802_v57 = vadd.f32 %v801_v26, %v640_v32  ;;  %v1456_v32 = vld [vmem:[%s1744_s19 + $0x38] sm:$0xff] }
 0x19b   : > { %1256 = vst [vmem:[%s2077_s15 + $0x180] sm:$0xff] %v1192_v56  ;;  %v1193_v18 = vmul.f32 %v802_v57, %v1947_v40  ;;  %v644_v8 = vpop.f32.mrf.mxu0 }
 0x19c   : > { %v805_v22 = vpop.f32.mrf.mxu1 }
 0x19d   : > { %1257 = vst [vmem:[%s2077_s15 + $0x188] sm:$0xff] %v1193_v18  ;;  %v806_v2 = vadd.f32 %v805_v22, %v644_v8  ;;  %v646_v60 = vpop.f32.mrf.mxu0  ;;  %v1457_v8 = vld [vmem:[%s1744_s19 + $0x50] sm:$0xff] }
 0x19e   : > { %v807_v12 = vpop.f32.mrf.mxu1 }
 0x19f   : > { %v1196_v4 = vmul.f32 %v806_v2, %v2308_v23  ;;  %v808_v5 = vadd.f32 %v807_v12, %v646_v60 }
 0x1a1   : > { %1260 = vst [vmem:[%s2077_s15 + $0x1a0] sm:$0xff] %v1196_v4  ;;  %v1197_v20 = vmul.f32 %v808_v5, %v2306_v11  ;;  %v650_v1 = vpop.f32.mrf.mxu0  ;;  %v1458_v4 = vld [vmem:[%s1744_s19 + $0x58] sm:$0xff] }
 0x1a2   : > { %v811_v38 = vpop.f32.mrf.mxu1 }
 0x1a3   : > { %1261 = vst [vmem:[%s2077_s15 + $0x1a8] sm:$0xff] %v1197_v20  ;;  %v812_v36 = vadd.f32 %v811_v38, %v650_v1  ;;  %v652_v40 = vpop.f32.mrf.mxu0 }
 0x1a4   : > { %v813_v21 = vpop.f32.mrf.mxu1 }
 0x1a5   : > { %v1200_v59 = vmul.f32 %v812_v36, %v2312_v47  ;;  %v814_v30 = vadd.f32 %v813_v21, %v652_v40  ;;  %v1459_v36 = vld [vmem:[%s1744_s19 + $0x70] sm:$0xff] }
 0x1a7   : > { %1264 = vst [vmem:[%s2077_s15 + $0x1c0] sm:$0xff] %v1200_v59  ;;  %v1201_v34 = vmul.f32 %v814_v30, %v2310_v35  ;;  %v656_v23 = vpop.f32.mrf.mxu0 }
 0x1a8   : > { %v817_v63 = vpop.f32.mrf.mxu1 }
 0x1a9   : > { %1265 = vst [vmem:[%s2077_s15 + $0x1c8] sm:$0xff] %v1201_v34  ;;  %v818_v0 = vadd.f32 %v817_v63, %v656_v23  ;;  %v658_v11 = vpop.f32.mrf.mxu0  ;;  %v1460_v34 = vld [vmem:[%s1744_s19 + $0x78] sm:$0xff] }
 0x1aa   : > { %v819_v13 = vpop.f32.mrf.mxu1 }
 0x1ab   : > { %v1204_v54 = vmul.f32 %v818_v0, %v2001_v24  ;;  %v820_v19 = vadd.f32 %v819_v13, %v658_v11  ;;  %v1461_v13 = vld [vmem:[%s1744_s19 + $0x90] sm:$0xff] }
 0x1ad   : > { %1268 = vst [vmem:[%s2077_s15 + $0x1e0] sm:$0xff] %v1204_v54  ;;  %v1205_v47 = vmul.f32 %v820_v19, %v1995_v45  ;;  %v888_v50 = vpop.f32.mrf.mxu0 }
 0x1ae   : > { %v1049_v48 = vpop.f32.mrf.mxu1 }
 0x1af   : > { %1269 = vst [vmem:[%s2077_s15 + $0x1e8] sm:$0xff] %v1205_v47  ;;  %v1050_v35 = vadd.f32 %v1049_v48, %v888_v50  ;;  %v890_v31 = vpop.f32.mrf.mxu0  ;;  %v1462_v48 = vld [vmem:[%s1744_s19 + $0x98] sm:$0xff] }
 0x1b0   : > { %v1051_v14 = vpop.f32.mrf.mxu1 }
 0x1b1   : > { %v1146_v37 = vmul.f32 %v1453_v46, %v1050_v35  ;;  %v1052_v16 = vadd.f32 %v1051_v14, %v890_v31  ;;  %v894_v49 = vpop.f32.mrf.mxu0 }
 0x1b2   : > { %v1055_v24 = vpop.f32.mrf.mxu1 }
 0x1b3   : > { %1210 = vst [vmem:[%s2077_s15 + $0x10] sm:$0xff] %v1146_v37  ;;  %v1147_v6 = vmul.f32 %v1454_v10, %v1052_v16  ;;  %v1056_v45 = vadd.f32 %v1055_v24, %v894_v49  ;;  %v896_v25 = vpop.f32.mrf.mxu0  ;;  %v1463_v37 = vld [vmem:[%s1744_s19 + $0xb0] sm:$0xff] }
 0x1b4   : > { %v1057_v62 = vpop.f32.mrf.mxu1 }
 0x1b5   : > { %1211 = vst [vmem:[%s2077_s15 + $0x18] sm:$0xff] %v1147_v6  ;;  %v1150_v28 = vmul.f32 %v1455_v44, %v1056_v45  ;;  %v1058_v42 = vadd.f32 %v1057_v62, %v896_v25  ;;  %v900_v58 = vpop.f32.mrf.mxu0  ;;  %v1464_v6 = vld [vmem:[%s1744_s19 + $0xb8] sm:$0xff] }
 0x1b6   : > { %v1061_v29 = vpop.f32.mrf.mxu1 }
 0x1b7   : > { %1214 = vst [vmem:[%s2077_s15 + $0x30] sm:$0xff] %v1150_v28  ;;  %v1151_v26 = vmul.f32 %v1456_v32, %v1058_v42  ;;  %v1062_v56 = vadd.f32 %v1061_v29, %v900_v58  ;;  %v902_v57 = vpop.f32.mrf.mxu0  ;;  %v1465_v28 = vld [vmem:[%s1744_s19 + $0xd0] sm:$0xff] }
 0x1b8   : > { %v1063_v18 = vpop.f32.mrf.mxu1 }
 0x1b9   : > { %1215 = vst [vmem:[%s2077_s15 + $0x38] sm:$0xff] %v1151_v26  ;;  %v1154_v22 = vmul.f32 %v1457_v8, %v1062_v56  ;;  %v1064_v2 = vadd.f32 %v1063_v18, %v902_v57  ;;  %v906_v60 = vpop.f32.mrf.mxu0  ;;  %v1466_v26 = vld [vmem:[%s1744_s19 + $0xd8] sm:$0xff] }
 0x1ba   : > { %v1067_v12 = vpop.f32.mrf.mxu1 }
 0x1bb   : > { %1218 = vst [vmem:[%s2077_s15 + $0x50] sm:$0xff] %v1154_v22  ;;  %v1155_v5 = vmul.f32 %v1458_v4, %v1064_v2  ;;  %v1068_v20 = vadd.f32 %v1067_v12, %v906_v60  ;;  %v908_v1 = vpop.f32.mrf.mxu0  ;;  %v1467_v22 = vld [vmem:[%s1744_s19 + $0xf0] sm:$0xff] }
 0x1bc   : > { %v1069_v38 = vpop.f32.mrf.mxu1 }
 0x1bd   : > { %1219 = vst [vmem:[%s2077_s15 + $0x58] sm:$0xff] %v1155_v5  ;;  %v1158_v40 = vmul.f32 %v1459_v36, %v1068_v20  ;;  %v1070_v21 = vadd.f32 %v1069_v38, %v908_v1  ;;  %v912_v59 = vpop.f32.mrf.mxu0  ;;  %v1468_v5 = vld [vmem:[%s1744_s19 + $0xf8] sm:$0xff] }
 0x1be   : > { %v1073_v30 = vpop.f32.mrf.mxu1 }
 0x1bf   : > { %1222 = vst [vmem:[%s2077_s15 + $0x70] sm:$0xff] %v1158_v40  ;;  %v1159_v23 = vmul.f32 %v1460_v34, %v1070_v21  ;;  %v1074_v63 = vadd.f32 %v1073_v30, %v912_v59  ;;  %v914_v0 = vpop.f32.mrf.mxu0  ;;  %v1469_v34 = vld [vmem:[%s1744_s19 + $0x118] sm:$0xff] }
 0x1c0   : > { %v1075_v11 = vpop.f32.mrf.mxu1 }
 0x1c1   : > { %1223 = vst [vmem:[%s2077_s15 + $0x78] sm:$0xff] %v1159_v23  ;;  %v1162_v54 = vmul.f32 %v1461_v13, %v1074_v63  ;;  %v1076_v19 = vadd.f32 %v1075_v11, %v914_v0  ;;  %v918_v47 = vpop.f32.mrf.mxu0 }
 0x1c2   : > { %v1079_v50 = vpop.f32.mrf.mxu1 }
 0x1c3   : > { %1226 = vst [vmem:[%s2077_s15 + $0x90] sm:$0xff] %v1162_v54  ;;  %v1163_v35 = vmul.f32 %v1462_v48, %v1076_v19  ;;  %v1080_v31 = vadd.f32 %v1079_v50, %v918_v47  ;;  %v920_v14 = vpop.f32.mrf.mxu0 }
 0x1c4   : > { %v1081_v46 = vpop.f32.mrf.mxu1 }
 0x1c5   : > { %1227 = vst [vmem:[%s2077_s15 + $0x98] sm:$0xff] %v1163_v35  ;;  %v1166_v16 = vmul.f32 %v1463_v37, %v1080_v31  ;;  %v1082_v49 = vadd.f32 %v1081_v46, %v920_v14  ;;  %v924_v24 = vpop.f32.mrf.mxu0 }
 0x1c6   : > { %v1085_v10 = vpop.f32.mrf.mxu1 }
 0x1c7   : > { %1230 = vst [vmem:[%s2077_s15 + $0xb0] sm:$0xff] %v1166_v16  ;;  %v1167_v45 = vmul.f32 %v1464_v6, %v1082_v49  ;;  %v1086_v25 = vadd.f32 %v1085_v10, %v924_v24  ;;  %v926_v62 = vpop.f32.mrf.mxu0 }
 0x1c8   : > { %v1087_v44 = vpop.f32.mrf.mxu1 }
 0x1c9   : > { %1231 = vst [vmem:[%s2077_s15 + $0xb8] sm:$0xff] %v1167_v45  ;;  %v1170_v42 = vmul.f32 %v1465_v28, %v1086_v25  ;;  %v1088_v58 = vadd.f32 %v1087_v44, %v926_v62  ;;  %v930_v29 = vpop.f32.mrf.mxu0 }
 0x1ca   : > { %v1091_v32 = vpop.f32.mrf.mxu1 }
 0x1cb   : > { %1234 = vst [vmem:[%s2077_s15 + $0xd0] sm:$0xff] %v1170_v42  ;;  %v1171_v56 = vmul.f32 %v1466_v26, %v1088_v58  ;;  %v1092_v57 = vadd.f32 %v1091_v32, %v930_v29  ;;  %v932_v18 = vpop.f32.mrf.mxu0 }
 0x1cc   : > { %v1093_v8 = vpop.f32.mrf.mxu1 }
 0x1cd   : > { %1235 = vst [vmem:[%s2077_s15 + $0xd8] sm:$0xff] %v1171_v56  ;;  %v1174_v2 = vmul.f32 %v1467_v22, %v1092_v57  ;;  %v1094_v60 = vadd.f32 %v1093_v8, %v932_v18  ;;  %v936_v12 = vpop.f32.mrf.mxu0 }
 0x1ce   : > { %v1097_v4 = vpop.f32.mrf.mxu1 }
 0x1cf   : > { %1238 = vst [vmem:[%s2077_s15 + $0xf0] sm:$0xff] %v1174_v2  ;;  %v1175_v20 = vmul.f32 %v1468_v5, %v1094_v60  ;;  %v1098_v1 = vadd.f32 %v1097_v4, %v936_v12  ;;  %v938_v38 = vpop.f32.mrf.mxu0 }
 0x1d0   : > { %v1099_v36 = vpop.f32.mrf.mxu1 }
 0x1d1   : > { %1239 = vst [vmem:[%s2077_s15 + $0xf8] sm:$0xff] %v1175_v20  ;;  %v1178_v40 = vmul.f32 %v1098_v1, %v1892_v55  ;;  %v1100_v21 = vadd.f32 %v1099_v36, %v938_v38  ;;  %v942_v59 = vpop.f32.mrf.mxu0 }
 0x1d2   : > { %v1103_v30 = vpop.f32.mrf.mxu1 }
 0x1d3   : > { %1242 = vst [vmem:[%s2077_s15 + $0x110] sm:$0xff] %v1178_v40  ;;  %v1179_v23 = vmul.f32 %v1469_v34, %v1100_v21  ;;  %v1104_v63 = vadd.f32 %v1103_v30, %v942_v59  ;;  %v944_v0 = vpop.f32.mrf.mxu0 }
 0x1d4   : > { %v1105_v11 = vpop.f32.mrf.mxu1 }
 0x1d5   : > { %1243 = vst [vmem:[%s2077_s15 + $0x118] sm:$0xff] %v1179_v23  ;;  %v1182_v13 = vmul.f32 %v1104_v63, %v1908_v17  ;;  %v1106_v54 = vadd.f32 %v1105_v11, %v944_v0  ;;  %v948_v19 = vpop.f32.mrf.mxu0 }
 0x1d6   : > { %v1109_v47 = vpop.f32.mrf.mxu1 }
 0x1d7   : > { %1246 = vst [vmem:[%s2077_s15 + $0x130] sm:$0xff] %v1182_v13  ;;  %v1183_v55 = vmul.f32 %v1106_v54, %v1902_v7  ;;  %v1110_v50 = vadd.f32 %v1109_v47, %v948_v19  ;;  %v950_v48 = vpop.f32.mrf.mxu0 }
 0x1d8   : > { %v1111_v35 = vpop.f32.mrf.mxu1 }
 0x1d9   : > { %1247 = vst [vmem:[%s2077_s15 + $0x138] sm:$0xff] %v1183_v55  ;;  %v1186_v31 = vmul.f32 %v1110_v50, %v1924_v43  ;;  %v1112_v14 = vadd.f32 %v1111_v35, %v950_v48  ;;  %v954_v46 = vpop.f32.mrf.mxu0 }
 0x1da   : > { %v1115_v37 = vpop.f32.mrf.mxu1 }
 0x1db   : > { %1250 = vst [vmem:[%s2077_s15 + $0x150] sm:$0xff] %v1186_v31  ;;  %v1187_v17 = vmul.f32 %v1112_v14, %v1918_v33  ;;  %v1116_v16 = vadd.f32 %v1115_v37, %v954_v46  ;;  %v956_v49 = vpop.f32.mrf.mxu0 }
 0x1dc   : > { %v1117_v24 = vpop.f32.mrf.mxu1 }
 0x1dd   : > { %1251 = vst [vmem:[%s2077_s15 + $0x158] sm:$0xff] %v1187_v17  ;;  %v1190_v7 = vmul.f32 %v1116_v16, %v1940_v9  ;;  %v1118_v10 = vadd.f32 %v1117_v24, %v956_v49  ;;  %v960_v6 = vpop.f32.mrf.mxu0 }
 0x1de   : > { %v1121_v45 = vpop.f32.mrf.mxu1 }
 0x1df   : > { %1254 = vst [vmem:[%s2077_s15 + $0x170] sm:$0xff] %v1190_v7  ;;  %v1191_v43 = vmul.f32 %v1118_v10, %v1934_v61  ;;  %v1122_v25 = vadd.f32 %v1121_v45, %v960_v6  ;;  %v962_v62 = vpop.f32.mrf.mxu0 }
 0x1e0   : > { %v1123_v44 = vpop.f32.mrf.mxu1 }
 0x1e1   : > { %1255 = vst [vmem:[%s2077_s15 + $0x178] sm:$0xff] %v1191_v43  ;;  %v1194_v33 = vmul.f32 %v1122_v25, %v2305_v3  ;;  %v1124_v28 = vadd.f32 %v1123_v44, %v962_v62  ;;  %v966_v42 = vpop.f32.mrf.mxu0 }
 0x1e2   : > { %v1127_v58 = vpop.f32.mrf.mxu1 }
 0x1e3   : > { %1258 = vst [vmem:[%s2077_s15 + $0x190] sm:$0xff] %v1194_v33  ;;  %v1195_v9 = vmul.f32 %v1124_v28, %v1950_v41  ;;  %v1128_v29 = vadd.f32 %v1127_v58, %v966_v42  ;;  %v968_v32 = vpop.f32.mrf.mxu0 }
 0x1e4   : > { %v1129_v26 = vpop.f32.mrf.mxu1 }
 0x1e5   : > { %1259 = vst [vmem:[%s2077_s15 + $0x198] sm:$0xff] %v1195_v9  ;;  %v1198_v61 = vmul.f32 %v1128_v29, %v2309_v27  ;;  %v1130_v56 = vadd.f32 %v1129_v26, %v968_v32  ;;  %v972_v57 = vpop.f32.mrf.mxu0 }
 0x1e6   : > { %v1133_v18 = vpop.f32.mrf.mxu1 }
 0x1e7   : > { %1262 = vst [vmem:[%s2077_s15 + $0x1b0] sm:$0xff] %v1198_v61  ;;  %v1199_v3 = vmul.f32 %v1130_v56, %v2307_v15  ;;  %v1134_v8 = vadd.f32 %v1133_v18, %v972_v57  ;;  %v974_v22 = vpop.f32.mrf.mxu0 }
 0x1e8   : > { %v1135_v2 = vpop.f32.mrf.mxu1 }
 0x1e9   : > { %1263 = vst [vmem:[%s2077_s15 + $0x1b8] sm:$0xff] %v1199_v3  ;;  %v1202_v41 = vmul.f32 %v1134_v8, %v2313_v51  ;;  %v1136_v60 = vadd.f32 %v1135_v2, %v974_v22  ;;  %v978_v12 = vpop.f32.mrf.mxu0 }
 0x1ea   : > { %v1139_v27 = vpop.f32.mrf.mxu1 }
 0x1eb   : > { %1266 = vst [vmem:[%s2077_s15 + $0x1d0] sm:$0xff] %v1202_v41  ;;  %v1203_v4 = vmul.f32 %v1136_v60, %v2311_v39  ;;  %v1140_v5 = vadd.f32 %v1139_v27, %v978_v12  ;;  %v980_v15 = vpop.f32.mrf.mxu0 }
 0x1ec   : > { %v1141_v20 = vpop.f32.mrf.mxu1 }
 0x1ed   : > { %1267 = vst [vmem:[%s2077_s15 + $0x1d8] sm:$0xff] %v1203_v4  ;;  %v1206_v1 = vmul.f32 %v1140_v5, %v2004_v52  ;;  %v1142_v38 = vadd.f32 %v1141_v20, %v980_v15 }
 0x1ef   : > { %1270 = vst [vmem:[%s2077_s15 + $0x1f0] sm:$0xff] %v1206_v1  ;;  %v1207_v39 = vmul.f32 %v1142_v38, %v1998_v53 }
 0x1f1   : > { %1271 = vst [vmem:[%s2077_s15 + $0x1f8] sm:$0xff] %v1207_v39 }
 0x1f2   : > { %1537 = shalt.err (!%p1534_p0)
}
 0x1f3   : > { %s1538_s4 = scalar_lea.hbm %s2208_s18, 8192  ;;  %s1542_s6 = scalar_lea.hbm %s2258_s2, 16384 }
 0x1f4   : > { %p1539_p5 = scmp.ne.s32.totalorder %s2208_s18, %s1538_s4  ;;  %p1543_p4 = scmp.lt.s32.totalorder %s2208_s18, %s2258_s2 }
 0x1f5   : > { %p1544_p6 = scmp.lt.s32.totalorder %s1542_s6, %s1538_s4 }
 0x1f6   : > { %p1540_p2 = pnand %p1539_p5, %p2314_p11 }
 0x1f7   : > { %p1545_p8 = por %p1544_p6, %p1543_p4 }
 0x1f8   : > { %p1541_p1 = pneg %p1540_p2 }
 0x1fa   : > { %p1546_p3 = pnand %p1545_p8, %p1541_p1 }
 0x1fc   : > { %1549 = shalt.err (!%p1546_p3)
}
 0x1fd   : > { %s1599_s23 = smov 512   ;;  %s1600_s19 = smov 32  }
 0x1fe   : > { %1398 = dma.vmem_to_hbm [thread:$0]  (%p2314_p11), %s2210_s25, 8192, %s2208_s18, %s1273_s13, %s1599_s23, %s1599_s23, %s1600_s19  }
 0x1ff PF: > { %s1302_s15 = sand.u32 1, %s1580_s9   ;;  %p2315_p7 = scmp.ne.s32.totalorder %s2284_s16, 0 }
 0x200   : > { %p2316_p9 = scmp.ge.s32.totalorder %s1592_s12, 2  ;;  %s1303_s17 = scalar_lea.sflag [#allocation4], %s1302_s15 }
 0x202   : > { %p1409_p10 = pnand %p2316_p9, %p2315_p7 }
 0x204   : > { %p1410_p12 = pneg %p1409_p10 }
 0x206   : > { %1575 = dma.done.wait (%p1410_p12), %s1303_s17, 8192  }
 0x207   : > { %1577 = vsyncadd (%p1410_p12), %s1303_s17, 4294959104  ;;  %p16_p13 = scmp.ge.s32.totalorder %s1670_s21, 4   ;;  %s2317_s9 = smov %s1584_s10 }
 0x208   : > { %s2318_s10 = smov %s1588_s11  ;;  %s2319_s11 = smov %s1690_s29 }
 0x209   : > { %s2320_s12 = smov %s1670_s21  ;;  %18 = sbr.rel (!%p16_p13) target bundleno = 6 (0x6), region = 77 }
 0x20e   :  { %1308 = vsyncpa [#allocation3], 1 }
 0x20f   :  { %1310 = vsyncpa [#allocation3 + $0x1], 1 }
 0x210   :  { %1311 = vsyncpa [#allocation6], 1 }
 0x211   :  { %1312 = vsyncpa [#allocation4], 1 }
 0x212   :  { %1314 = vsyncpa [#allocation4 + $0x1], 1 }

</bundles_post_ra>
